<compile_context>
chip_gen: v5e
topology: v5e:2x2
jax: 0.10.0
libtpu: 0.0.40
codegen_flags: <defaults>
</compile_context>

<pallas_src>
import functools
import math

import jax
import jax.numpy as jnp
from jax import lax
from jax.experimental import pallas as pl
from jax.experimental.pallas import tpu as pltpu


def _round_up(x, m):
    return ((x + m - 1) // m) * m


# ----------------------------- Decoder kernel --------------------------------
def decoder_kernel(x_ref, z_ref, w_l2h_ref, b_l2h_ref,
                   w_ih_ref, w_hh_ref, b_ih_ref, b_hh_n_ref,
                   w_out_ref, b_out_ref, out_ref,
                   gi_scr, h_all_scr, *, seq_len, batch_block):
    T, BB = seq_len, batch_block
    E = x_ref.shape[-1]
    H = w_hh_ref.shape[0]
    Vp = w_out_ref.shape[1]

    # latent2hidden -> tanh   (hidden_factor = n_layers = 1)
    h = jnp.tanh(jnp.dot(z_ref[...], w_l2h_ref[...],
                         preferred_element_type=jnp.float32) + b_l2h_ref[...])   # [BB, H]

    # Hoisted input-side GRU matmul for ALL timesteps at once, staged in VMEM
    # (not kept live in vregs).  b_ih already has the r/z thirds of b_hh folded
    # in (wrapper), so only the n-gate hidden bias remains in-loop.
    x_flat = x_ref[...].reshape(T * BB, E)
    gi_scr[...] = (jnp.dot(x_flat, w_ih_ref[...],
                           preferred_element_type=jnp.float32) + b_ih_ref[...])  # [T*BB, 3H]

    w_hh = w_hh_ref[...]
    b_hh_n = jnp.broadcast_to(b_hh_n_ref[...], (BB, H))   # hoisted, not re-emitted per step

    def step(t, h_prev):
        # gi rows for step t live at sublane-aligned offset t*BB in the scratch.
        row = t * BB if isinstance(t, int) else pl.multiple_of(t * BB, BB)
        gi = gi_scr[pl.ds(row, BB), :]                                            # [BB, 3H]
        gh = jnp.dot(h_prev, w_hh, preferred_element_type=jnp.float32)            # [BB, 3H]
        i_r, i_z, i_n = gi[:, :H], gi[:, H:2 * H], gi[:, 2 * H:]
        h_r, h_z, h_n = gh[:, :H], gh[:, H:2 * H], gh[:, 2 * H:]
        r = jax.nn.sigmoid(i_r + h_r)              # b_ir + b_hr already in gi
        zg = jax.nn.sigmoid(i_z + h_z)             # b_iz + b_hz already in gi
        n = jnp.tanh(i_n + r * (h_n + b_hh_n))     # PyTorch GRU: r * (W_hn h + b_hn)
        h_new = (1.0 - zg) * n + zg * h_prev
        h_all_scr[pl.ds(row, BB), :] = h_new
        return h_new

    if T <= 16:
        # Static unroll (small T); h carried in vregs.
        for t in range(T):
            h = step(t, h)
    else:
        # Bounded live ranges / code size for long sequences.
        h = lax.fori_loop(0, T, step, h, unroll=2)

    # Deferred outputs2vocab: one lane-dense [T*BB, H] @ [H, Vp] matmul, read
    # directly from the 2-D hidden-state scratch (no reshape of the scratch).
    logits = (jnp.dot(h_all_scr[...], w_out_ref[...],
                      preferred_element_type=jnp.float32) + b_out_ref[...])       # [T*BB, Vp]
    out_ref[...] = logits.reshape(T, BB, Vp)


# ----------------------------- Wrapper ----------------------------------------
def decoder_forward(params, input_embedding, latent, *, batch_block=8):
    """input_embedding: [B, T, E] (batch_first), latent: [B, L] -> logits [B, T, V]."""
    B, T, E = input_embedding.shape
    L = latent.shape[1]
    H = params["w_hh"].shape[0]
    V = params["w_out"].shape[1]

    assert H % 128 == 0, "hidden_size must be a multiple of 128 (lane-aligned gate slices)"
    assert batch_block % 8 == 0, "batch block must be a multiple of 8 sublanes"

    BB = batch_block
    Bp = _round_up(B, BB)      # batch padded to the batch block (multiple of 8 sublanes)
    Vp = _round_up(V, 128)     # lane padding -> unmasked vocab-projection store
    nb = Bp // BB              # batch-parallel grid (megacore on v7x)

    # time-major, batch-padded embeddings: [T, Bp, E]
    x = jnp.transpose(input_embedding, (1, 0, 2))
    x = jnp.pad(x, ((0, 0), (0, Bp - B), (0, 0)))
    z = jnp.pad(latent, ((0, Bp - B), (0, 0)))                     # [Bp, L]

    # Fold the r/z thirds of b_hh into b_ih (only the n-gate hidden bias must
    # stay inside r*(...) in the recurrence).
    b_ih_folded = params["b_ih"] + jnp.concatenate(
        [params["b_hh"][:, :2 * H], jnp.zeros((1, H), params["b_hh"].dtype)], axis=1)
    b_hh_n = params["b_hh"][:, 2 * H:]                             # [1, H]

    w_out = jnp.pad(params["w_out"], ((0, 0), (0, Vp - V)))        # [H, Vp]
    b_out = jnp.pad(params["b_out"], ((0, 0), (0, Vp - V)))        # [1, Vp]

    kernel = functools.partial(decoder_kernel, seq_len=T, batch_block=BB)

    def fixed(shape):
        # full-array block, same tile for every grid step
        return pl.BlockSpec(shape, lambda b, _s=len(shape): (0,) * _s)

    # advisory cost estimate for XLA scheduling around the custom call
    flops = int(2 * Bp * L * H                 # latent2hidden
                + 2 * T * Bp * E * 3 * H       # hoisted input matmul
                + 2 * T * Bp * H * 3 * H       # recurrence
                + 2 * T * Bp * H * Vp)         # vocab projection
    transcendentals = int(Bp * H + 4 * T * Bp * H)
    bytes_accessed = int(4 * (T * Bp * E + Bp * L
                              + L * H + H + E * 3 * H + H * 3 * H + 3 * H + H
                              + H * Vp + Vp + T * Bp * Vp))

    # per-block VMEM residency (double-buffered blocks + weights + scratch)
    need = 4 * (2 * (T * BB * E + BB * L)
                + 2 * (L * H + H + E * 3 * H + H * 3 * H + 3 * H + H + H * Vp + Vp)
                + 2 * T * BB * Vp
                + T * BB * (3 * H + H))
    vmem_limit = int(min(64 * 2**20, max(16 * 2**20, 2 * need)))

    out = pl.pallas_call(
        kernel,
        out_shape=jax.ShapeDtypeStruct((T, Bp, Vp), jnp.float32),
        grid_spec=pltpu.PrefetchScalarGridSpec(
            num_scalar_prefetch=0,
            grid=(nb,),
            in_specs=[
                pl.BlockSpec((T, BB, E), lambda b: (0, b, 0)),     # x (time-major)
                pl.BlockSpec((BB, L), lambda b: (b, 0)),           # latent
                fixed(params["w_l2h"].shape),
                fixed(params["b_l2h"].shape),
                fixed(params["w_ih"].shape),
                fixed(params["w_hh"].shape),
                fixed(b_ih_folded.shape),
                fixed(b_hh_n.shape),
                fixed(w_out.shape),
                fixed(b_out.shape),
            ],
            out_specs=pl.BlockSpec((T, BB, Vp), lambda b: (0, b, 0)),
            scratch_shapes=[
                pltpu.VMEM((T * BB, 3 * H), jnp.float32),   # staged gi (input-side gates)
                pltpu.VMEM((T * BB, H), jnp.float32),       # hidden states, 2-D layout
            ]),
        compiler_params=pltpu.CompilerParams(
            dimension_semantics=("parallel",),
            vmem_limit_bytes=vmem_limit),
        cost_estimate=pl.CostEstimate(flops=flops,
                                      transcendentals=transcendentals,
                                      bytes_accessed=bytes_accessed),
    )(x, z, params["w_l2h"], params["b_l2h"],
      params["w_ih"], params["w_hh"], b_ih_folded, b_hh_n,
      w_out, b_out)

    logits = out[:, :B, :V]                                        # [T, B, V]
    return jnp.transpose(logits, (1, 0, 2))                        # [B, T, V]


# ----------------------------- Pure-JAX reference ------------------------------
def decoder_reference(params, input_embedding, latent):
    H = params["w_hh"].shape[0]
    h = jnp.tanh(latent @ params["w_l2h"] + params["b_l2h"])       # [B, H]
    x_tbe = jnp.transpose(input_embedding, (1, 0, 2))              # [T, B, E]

    def step(h, x_t):
        gi = x_t @ params["w_ih"] + params["b_ih"]
        gh = h @ params["w_hh"] + params["b_hh"]
        i_r, i_z, i_n = gi[:, :H], gi[:, H:2 * H], gi[:, 2 * H:]
        h_r, h_z, h_n = gh[:, :H], gh[:, H:2 * H], gh[:, 2 * H:]
        r = jax.nn.sigmoid(i_r + h_r)
        zg = jax.nn.sigmoid(i_z + h_z)
        n = jnp.tanh(i_n + r * h_n)
        h_new = (1.0 - zg) * n + zg * h
        return h_new, h_new

    _, hs = lax.scan(step, h, x_tbe)                               # [T, B, H]
    logits = hs @ params["w_out"] + params["b_out"]                # [T, B, V]
    return jnp.transpose(logits, (1, 0, 2))                        # [B, T, V]


# ----------------------------- Parameter init ---------------------------------
def init_params(key, input_size, hidden_size, latent_size, vocab_size):
    E, H, L, V = input_size, hidden_size, latent_size, vocab_size
    ks = jax.random.split(key, 8)

    def u(k, shape, fan_in):
        s = 1.0 / math.sqrt(fan_in)
        return jax.random.uniform(k, shape, jnp.float32, -s, s)

    return {
        # latent2hidden
        "w_l2h": u(ks[0], (L, H), L),
        "b_l2h": u(ks[1], (1, H), L),
        # GRU (weights stored transposed: [in, 3H], gate order r|z|n)
        "w_ih": u(ks[2], (E, 3 * H), H),
        "w_hh": u(ks[3], (H, 3 * H), H),
        "b_ih": u(ks[4], (1, 3 * H), H),
        "b_hh": u(ks[5], (1, 3 * H), H),
        # outputs2vocab
        "w_out": u(ks[6], (H, V), H),
        "b_out": u(ks[7], (1, V), H),
    }


# ----------------------------- Main -------------------------------------------
if __name__ == "__main__":
    INPUT_SIZE = 64     # GRU input_size (embedding dim)
    HIDDEN_SIZE = 128   # multiple of 128 -> lane-aligned gate slices
    LATENT_SIZE = 32
    VOCAB_SIZE = 64     # padded to 128 lanes inside the wrapper
    BATCH = 4           # padded to the 8-row batch block inside the wrapper
    SEQ_LEN = 8

    root = jax.random.PRNGKey(0)
    k_p, k_x, k_z = jax.random.split(root, 3)

    params = init_params(k_p, INPUT_SIZE, HIDDEN_SIZE, LATENT_SIZE, VOCAB_SIZE)
    input_embedding = jax.random.normal(
        k_x, (BATCH, SEQ_LEN, INPUT_SIZE), jnp.float32)
    latent = jax.random.normal(k_z, (BATCH, LATENT_SIZE), jnp.float32)

    fwd = jax.jit(lambda x, z: decoder_forward(params, x, z))
    out = fwd(input_embedding, latent)
    jax.block_until_ready(out)

    assert out.shape == (BATCH, SEQ_LEN, VOCAB_SIZE)

    ref = decoder_reference(params, input_embedding, latent)
    max_err = float(jnp.max(jnp.abs(out - ref)))
    assert max_err < 1e-4, f"max abs error vs reference: {max_err}"

    print("KERNEL_OK")
</pallas_src>

<mosaic_0001>
module attributes {stable_mosaic.version = 11 : i64} {
  func.func @decoder_kernel(%arg0: i32, %arg1: memref<8x8x64xf32, #tpu.memory_space<vmem>>, %arg2: memref<8x32xf32, #tpu.memory_space<vmem>>, %arg3: memref<32x128xf32, #tpu.memory_space<vmem>>, %arg4: memref<1x128xf32, #tpu.memory_space<vmem>>, %arg5: memref<64x384xf32, #tpu.memory_space<vmem>>, %arg6: memref<128x384xf32, #tpu.memory_space<vmem>>, %arg7: memref<1x384xf32, #tpu.memory_space<vmem>>, %arg8: memref<1x128xf32, #tpu.memory_space<vmem>>, %arg9: memref<128x128xf32, #tpu.memory_space<vmem>>, %arg10: memref<1x128xf32, #tpu.memory_space<vmem>>, %arg11: memref<8x8x128xf32, #tpu.memory_space<vmem>>, %arg12: memref<64x384xf32, #tpu.memory_space<vmem>>, %arg13: memref<64x128xf32, #tpu.memory_space<vmem>>) attributes {dimension_semantics = [#tpu.dimension_semantics<parallel>], iteration_bounds = array<i64: 1>, scalar_prefetch = 0 : i64, scratch_operands = 2 : i64, tpu.core_type = #tpu.core_type<tc>, window_params = [{transform_indices = @transform_0, window_bounds = array<i64: 8, 8, 64>}, {transform_indices = @transform_1, window_bounds = array<i64: 8, 32>}, {pipeline_mode = #tpu.pipeline_mode<synchronous>, transform_indices = @transform_2, window_bounds = array<i64: 32, 128>}, {pipeline_mode = #tpu.pipeline_mode<synchronous>, transform_indices = @transform_3, window_bounds = array<i64: 1, 128>}, {pipeline_mode = #tpu.pipeline_mode<synchronous>, transform_indices = @transform_4, window_bounds = array<i64: 64, 384>}, {pipeline_mode = #tpu.pipeline_mode<synchronous>, transform_indices = @transform_5, window_bounds = array<i64: 128, 384>}, {pipeline_mode = #tpu.pipeline_mode<synchronous>, transform_indices = @transform_6, window_bounds = array<i64: 1, 384>}, {pipeline_mode = #tpu.pipeline_mode<synchronous>, transform_indices = @transform_7, window_bounds = array<i64: 1, 128>}, {pipeline_mode = #tpu.pipeline_mode<synchronous>, transform_indices = @transform_8, window_bounds = array<i64: 128, 128>}, {pipeline_mode = #tpu.pipeline_mode<synchronous>, transform_indices = @transform_9, window_bounds = array<i64: 1, 128>}, {transform_indices = @transform_10, window_bounds = array<i64: 8, 8, 128>}]} {
    %c0 = arith.constant 0 : index
    %c0_0 = arith.constant 0 : index
    %0 = vector.load %arg2[%c0, %c0_0] : memref<8x32xf32, #tpu.memory_space<vmem>>, vector<8x32xf32>
    %c0_1 = arith.constant 0 : index
    %c0_2 = arith.constant 0 : index
    %1 = vector.load %arg3[%c0_1, %c0_2] : memref<32x128xf32, #tpu.memory_space<vmem>>, vector<32x128xf32>
    %cst = arith.constant dense<0.000000e+00> : vector<8x128xf32>
    %2 = tpu.matmul %0, %1, %cst {dimension_numbers = #tpu.dot_dimension_numbers<[1], [0], [0], [1], [0, 0, 1, 1], [], []>} : vector<8x32xf32>, vector<32x128xf32>, vector<8x128xf32> -> vector<8x128xf32>
    %c0_3 = arith.constant 0 : index
    %c0_4 = arith.constant 0 : index
    %3 = vector.load %arg4[%c0_3, %c0_4] : memref<1x128xf32, #tpu.memory_space<vmem>>, vector<1x128xf32>
    %4 = vector.broadcast %3 : vector<1x128xf32> to vector<8x128xf32>
    %5 = arith.addf %2, %4 : vector<8x128xf32>
    %6 = math.tanh %5 : vector<8x128xf32>
    %c0_5 = arith.constant 0 : index
    %c0_6 = arith.constant 0 : index
    %c0_7 = arith.constant 0 : index
    %7 = vector.load %arg1[%c0_5, %c0_6, %c0_7] : memref<8x8x64xf32, #tpu.memory_space<vmem>>, vector<8x8x64xf32>
    %8 = vector.shape_cast %7 : vector<8x8x64xf32> to vector<64x64xf32>
    %c0_8 = arith.constant 0 : index
    %c0_9 = arith.constant 0 : index
    %9 = vector.load %arg5[%c0_8, %c0_9] : memref<64x384xf32, #tpu.memory_space<vmem>>, vector<64x384xf32>
    %cst_10 = arith.constant dense<0.000000e+00> : vector<64x384xf32>
    %10 = tpu.matmul %8, %9, %cst_10 {dimension_numbers = #tpu.dot_dimension_numbers<[1], [0], [0], [1], [0, 0, 1, 1], [], []>} : vector<64x64xf32>, vector<64x384xf32>, vector<64x384xf32> -> vector<64x384xf32>
    %c0_11 = arith.constant 0 : index
    %c0_12 = arith.constant 0 : index
    %11 = vector.load %arg7[%c0_11, %c0_12] : memref<1x384xf32, #tpu.memory_space<vmem>>, vector<1x384xf32>
    %12 = vector.broadcast %11 : vector<1x384xf32> to vector<64x384xf32>
    %13 = arith.addf %10, %12 : vector<64x384xf32>
    %c0_13 = arith.constant 0 : index
    %c0_14 = arith.constant 0 : index
    %14 = vector.load %arg12[%c0_13, %c0_14] : memref<64x384xf32, #tpu.memory_space<vmem>>, vector<64x384xf32>
    tpu.vector_store %arg12[%c0_13, %c0_14], %13 {strides = array<i32>} : memref<64x384xf32, #tpu.memory_space<vmem>>, vector<64x384xf32>,
    %c0_15 = arith.constant 0 : index
    %c0_16 = arith.constant 0 : index
    %15 = vector.load %arg6[%c0_15, %c0_16] : memref<128x384xf32, #tpu.memory_space<vmem>>, vector<128x384xf32>
    %c0_17 = arith.constant 0 : index
    %c0_18 = arith.constant 0 : index
    %16 = vector.load %arg8[%c0_17, %c0_18] : memref<1x128xf32, #tpu.memory_space<vmem>>, vector<1x128xf32>
    %17 = vector.shape_cast %16 : vector<1x128xf32> to vector<1x128xf32>
    %18 = vector.broadcast %17 : vector<1x128xf32> to vector<8x128xf32>
    %c0_19 = arith.constant 0 : index
    %c0_20 = arith.constant 0 : index
    %19 = vector.load %arg12[%c0_19, %c0_20] : memref<64x384xf32, #tpu.memory_space<vmem>>, vector<8x384xf32>
    %cst_21 = arith.constant dense<0.000000e+00> : vector<8x384xf32>
    %20 = tpu.matmul %6, %15, %cst_21 {dimension_numbers = #tpu.dot_dimension_numbers<[1], [0], [0], [1], [0, 0, 1, 1], [], []>} : vector<8x128xf32>, vector<128x384xf32>, vector<8x384xf32> -> vector<8x384xf32>
    %21 = vector.extract_strided_slice %19 {offsets = [0, 0], sizes = [8, 128], strides = [1, 1]} : vector<8x384xf32> to vector<8x128xf32>
    %22 = vector.extract_strided_slice %19 {offsets = [0, 128], sizes = [8, 128], strides = [1, 1]} : vector<8x384xf32> to vector<8x128xf32>
    %23 = vector.extract_strided_slice %19 {offsets = [0, 256], sizes = [8, 128], strides = [1, 1]} : vector<8x384xf32> to vector<8x128xf32>
    %24 = vector.extract_strided_slice %20 {offsets = [0, 0], sizes = [8, 128], strides = [1, 1]} : vector<8x384xf32> to vector<8x128xf32>
    %25 = vector.extract_strided_slice %20 {offsets = [0, 128], sizes = [8, 128], strides = [1, 1]} : vector<8x384xf32> to vector<8x128xf32>
    %26 = vector.extract_strided_slice %20 {offsets = [0, 256], sizes = [8, 128], strides = [1, 1]} : vector<8x384xf32> to vector<8x128xf32>
    %27 = arith.addf %21, %24 : vector<8x128xf32>
    %28 = arith.negf %27 : vector<8x128xf32>
    %29 = math.exp %28 : vector<8x128xf32>
    %cst_22 = arith.constant 1.000000e+00 : f32
    %30 = vector.broadcast %cst_22 : f32 to vector<8x128xf32>
    %31 = arith.addf %30, %29 : vector<8x128xf32>
    %32 = arith.divf %30, %31 : vector<8x128xf32>
    %33 = arith.addf %22, %25 : vector<8x128xf32>
    %34 = arith.negf %33 : vector<8x128xf32>
    %35 = math.exp %34 : vector<8x128xf32>
    %cst_23 = arith.constant 1.000000e+00 : f32
    %36 = vector.broadcast %cst_23 : f32 to vector<8x128xf32>
    %37 = arith.addf %36, %35 : vector<8x128xf32>
    %38 = arith.divf %36, %37 : vector<8x128xf32>
    %39 = arith.addf %26, %18 : vector<8x128xf32>
    %40 = arith.mulf %32, %39 : vector<8x128xf32>
    %41 = arith.addf %23, %40 : vector<8x128xf32>
    %42 = math.tanh %41 : vector<8x128xf32>
    %cst_24 = arith.constant 1.000000e+00 : f32
    %43 = vector.broadcast %cst_24 : f32 to vector<8x128xf32>
    %44 = arith.subf %43, %38 : vector<8x128xf32>
    %45 = arith.mulf %44, %42 : vector<8x128xf32>
    %46 = arith.mulf %38, %6 : vector<8x128xf32>
    %47 = arith.addf %45, %46 : vector<8x128xf32>
    %c0_25 = arith.constant 0 : index
    %c0_26 = arith.constant 0 : index
    %48 = vector.load %arg13[%c0_25, %c0_26] : memref<64x128xf32, #tpu.memory_space<vmem>>, vector<8x128xf32>
    tpu.vector_store %arg13[%c0_25, %c0_26], %47 {strides = array<i32>} : memref<64x128xf32, #tpu.memory_space<vmem>>, vector<8x128xf32>,
    %c8 = arith.constant 8 : index
    %c0_27 = arith.constant 0 : index
    %49 = vector.load %arg12[%c8, %c0_27] : memref<64x384xf32, #tpu.memory_space<vmem>>, vector<8x384xf32>
    %cst_28 = arith.constant dense<0.000000e+00> : vector<8x384xf32>
    %50 = tpu.matmul %47, %15, %cst_28 {dimension_numbers = #tpu.dot_dimension_numbers<[1], [0], [0], [1], [0, 0, 1, 1], [], []>} : vector<8x128xf32>, vector<128x384xf32>, vector<8x384xf32> -> vector<8x384xf32>
    %51 = vector.extract_strided_slice %49 {offsets = [0, 0], sizes = [8, 128], strides = [1, 1]} : vector<8x384xf32> to vector<8x128xf32>
    %52 = vector.extract_strided_slice %49 {offsets = [0, 128], sizes = [8, 128], strides = [1, 1]} : vector<8x384xf32> to vector<8x128xf32>
    %53 = vector.extract_strided_slice %49 {offsets = [0, 256], sizes = [8, 128], strides = [1, 1]} : vector<8x384xf32> to vector<8x128xf32>
    %54 = vector.extract_strided_slice %50 {offsets = [0, 0], sizes = [8, 128], strides = [1, 1]} : vector<8x384xf32> to vector<8x128xf32>
    %55 = vector.extract_strided_slice %50 {offsets = [0, 128], sizes = [8, 128], strides = [1, 1]} : vector<8x384xf32> to vector<8x128xf32>
    %56 = vector.extract_strided_slice %50 {offsets = [0, 256], sizes = [8, 128], strides = [1, 1]} : vector<8x384xf32> to vector<8x128xf32>
    %57 = arith.addf %51, %54 : vector<8x128xf32>
    %58 = arith.negf %57 : vector<8x128xf32>
    %59 = math.exp %58 : vector<8x128xf32>
    %cst_29 = arith.constant 1.000000e+00 : f32
    %60 = vector.broadcast %cst_29 : f32 to vector<8x128xf32>
    %61 = arith.addf %60, %59 : vector<8x128xf32>
    %62 = arith.divf %60, %61 : vector<8x128xf32>
    %63 = arith.addf %52, %55 : vector<8x128xf32>
    %64 = arith.negf %63 : vector<8x128xf32>
    %65 = math.exp %64 : vector<8x128xf32>
    %cst_30 = arith.constant 1.000000e+00 : f32
    %66 = vector.broadcast %cst_30 : f32 to vector<8x128xf32>
    %67 = arith.addf %66, %65 : vector<8x128xf32>
    %68 = arith.divf %66, %67 : vector<8x128xf32>
    %69 = arith.addf %56, %18 : vector<8x128xf32>
    %70 = arith.mulf %62, %69 : vector<8x128xf32>
    %71 = arith.addf %53, %70 : vector<8x128xf32>
    %72 = math.tanh %71 : vector<8x128xf32>
    %cst_31 = arith.constant 1.000000e+00 : f32
    %73 = vector.broadcast %cst_31 : f32 to vector<8x128xf32>
    %74 = arith.subf %73, %68 : vector<8x128xf32>
    %75 = arith.mulf %74, %72 : vector<8x128xf32>
    %76 = arith.mulf %68, %47 : vector<8x128xf32>
    %77 = arith.addf %75, %76 : vector<8x128xf32>
    %c8_32 = arith.constant 8 : index
    %c0_33 = arith.constant 0 : index
    %78 = vector.load %arg13[%c8_32, %c0_33] : memref<64x128xf32, #tpu.memory_space<vmem>>, vector<8x128xf32>
    tpu.vector_store %arg13[%c8_32, %c0_33], %77 {strides = array<i32>} : memref<64x128xf32, #tpu.memory_space<vmem>>, vector<8x128xf32>,
    %c16 = arith.constant 16 : index
    %c0_34 = arith.constant 0 : index
    %79 = vector.load %arg12[%c16, %c0_34] : memref<64x384xf32, #tpu.memory_space<vmem>>, vector<8x384xf32>
    %cst_35 = arith.constant dense<0.000000e+00> : vector<8x384xf32>
    %80 = tpu.matmul %77, %15, %cst_35 {dimension_numbers = #tpu.dot_dimension_numbers<[1], [0], [0], [1], [0, 0, 1, 1], [], []>} : vector<8x128xf32>, vector<128x384xf32>, vector<8x384xf32> -> vector<8x384xf32>
    %81 = vector.extract_strided_slice %79 {offsets = [0, 0], sizes = [8, 128], strides = [1, 1]} : vector<8x384xf32> to vector<8x128xf32>
    %82 = vector.extract_strided_slice %79 {offsets = [0, 128], sizes = [8, 128], strides = [1, 1]} : vector<8x384xf32> to vector<8x128xf32>
    %83 = vector.extract_strided_slice %79 {offsets = [0, 256], sizes = [8, 128], strides = [1, 1]} : vector<8x384xf32> to vector<8x128xf32>
    %84 = vector.extract_strided_slice %80 {offsets = [0, 0], sizes = [8, 128], strides = [1, 1]} : vector<8x384xf32> to vector<8x128xf32>
    %85 = vector.extract_strided_slice %80 {offsets = [0, 128], sizes = [8, 128], strides = [1, 1]} : vector<8x384xf32> to vector<8x128xf32>
    %86 = vector.extract_strided_slice %80 {offsets = [0, 256], sizes = [8, 128], strides = [1, 1]} : vector<8x384xf32> to vector<8x128xf32>
    %87 = arith.addf %81, %84 : vector<8x128xf32>
    %88 = arith.negf %87 : vector<8x128xf32>
    %89 = math.exp %88 : vector<8x128xf32>
    %cst_36 = arith.constant 1.000000e+00 : f32
    %90 = vector.broadcast %cst_36 : f32 to vector<8x128xf32>
    %91 = arith.addf %90, %89 : vector<8x128xf32>
    %92 = arith.divf %90, %91 : vector<8x128xf32>
    %93 = arith.addf %82, %85 : vector<8x128xf32>
    %94 = arith.negf %93 : vector<8x128xf32>
    %95 = math.exp %94 : vector<8x128xf32>
    %cst_37 = arith.constant 1.000000e+00 : f32
    %96 = vector.broadcast %cst_37 : f32 to vector<8x128xf32>
    %97 = arith.addf %96, %95 : vector<8x128xf32>
    %98 = arith.divf %96, %97 : vector<8x128xf32>
    %99 = arith.addf %86, %18 : vector<8x128xf32>
    %100 = arith.mulf %92, %99 : vector<8x128xf32>
    %101 = arith.addf %83, %100 : vector<8x128xf32>
    %102 = math.tanh %101 : vector<8x128xf32>
    %cst_38 = arith.constant 1.000000e+00 : f32
    %103 = vector.broadcast %cst_38 : f32 to vector<8x128xf32>
    %104 = arith.subf %103, %98 : vector<8x128xf32>
    %105 = arith.mulf %104, %102 : vector<8x128xf32>
    %106 = arith.mulf %98, %77 : vector<8x128xf32>
    %107 = arith.addf %105, %106 : vector<8x128xf32>
    %c16_39 = arith.constant 16 : index
    %c0_40 = arith.constant 0 : index
    %108 = vector.load %arg13[%c16_39, %c0_40] : memref<64x128xf32, #tpu.memory_space<vmem>>, vector<8x128xf32>
    tpu.vector_store %arg13[%c16_39, %c0_40], %107 {strides = array<i32>} : memref<64x128xf32, #tpu.memory_space<vmem>>, vector<8x128xf32>,
    %c24 = arith.constant 24 : index
    %c0_41 = arith.constant 0 : index
    %109 = vector.load %arg12[%c24, %c0_41] : memref<64x384xf32, #tpu.memory_space<vmem>>, vector<8x384xf32>
    %cst_42 = arith.constant dense<0.000000e+00> : vector<8x384xf32>
    %110 = tpu.matmul %107, %15, %cst_42 {dimension_numbers = #tpu.dot_dimension_numbers<[1], [0], [0], [1], [0, 0, 1, 1], [], []>} : vector<8x128xf32>, vector<128x384xf32>, vector<8x384xf32> -> vector<8x384xf32>
    %111 = vector.extract_strided_slice %109 {offsets = [0, 0], sizes = [8, 128], strides = [1, 1]} : vector<8x384xf32> to vector<8x128xf32>
    %112 = vector.extract_strided_slice %109 {offsets = [0, 128], sizes = [8, 128], strides = [1, 1]} : vector<8x384xf32> to vector<8x128xf32>
    %113 = vector.extract_strided_slice %109 {offsets = [0, 256], sizes = [8, 128], strides = [1, 1]} : vector<8x384xf32> to vector<8x128xf32>
    %114 = vector.extract_strided_slice %110 {offsets = [0, 0], sizes = [8, 128], strides = [1, 1]} : vector<8x384xf32> to vector<8x128xf32>
    %115 = vector.extract_strided_slice %110 {offsets = [0, 128], sizes = [8, 128], strides = [1, 1]} : vector<8x384xf32> to vector<8x128xf32>
    %116 = vector.extract_strided_slice %110 {offsets = [0, 256], sizes = [8, 128], strides = [1, 1]} : vector<8x384xf32> to vector<8x128xf32>
    %117 = arith.addf %111, %114 : vector<8x128xf32>
    %118 = arith.negf %117 : vector<8x128xf32>
    %119 = math.exp %118 : vector<8x128xf32>
    %cst_43 = arith.constant 1.000000e+00 : f32
    %120 = vector.broadcast %cst_43 : f32 to vector<8x128xf32>
    %121 = arith.addf %120, %119 : vector<8x128xf32>
    %122 = arith.divf %120, %121 : vector<8x128xf32>
    %123 = arith.addf %112, %115 : vector<8x128xf32>
    %124 = arith.negf %123 : vector<8x128xf32>
    %125 = math.exp %124 : vector<8x128xf32>
    %cst_44 = arith.constant 1.000000e+00 : f32
    %126 = vector.broadcast %cst_44 : f32 to vector<8x128xf32>
    %127 = arith.addf %126, %125 : vector<8x128xf32>
    %128 = arith.divf %126, %127 : vector<8x128xf32>
    %129 = arith.addf %116, %18 : vector<8x128xf32>
    %130 = arith.mulf %122, %129 : vector<8x128xf32>
    %131 = arith.addf %113, %130 : vector<8x128xf32>
    %132 = math.tanh %131 : vector<8x128xf32>
    %cst_45 = arith.constant 1.000000e+00 : f32
    %133 = vector.broadcast %cst_45 : f32 to vector<8x128xf32>
    %134 = arith.subf %133, %128 : vector<8x128xf32>
    %135 = arith.mulf %134, %132 : vector<8x128xf32>
    %136 = arith.mulf %128, %107 : vector<8x128xf32>
    %137 = arith.addf %135, %136 : vector<8x128xf32>
    %c24_46 = arith.constant 24 : index
    %c0_47 = arith.constant 0 : index
    %138 = vector.load %arg13[%c24_46, %c0_47] : memref<64x128xf32, #tpu.memory_space<vmem>>, vector<8x128xf32>
    tpu.vector_store %arg13[%c24_46, %c0_47], %137 {strides = array<i32>} : memref<64x128xf32, #tpu.memory_space<vmem>>, vector<8x128xf32>,
    %c32 = arith.constant 32 : index
    %c0_48 = arith.constant 0 : index
    %139 = vector.load %arg12[%c32, %c0_48] : memref<64x384xf32, #tpu.memory_space<vmem>>, vector<8x384xf32>
    %cst_49 = arith.constant dense<0.000000e+00> : vector<8x384xf32>
    %140 = tpu.matmul %137, %15, %cst_49 {dimension_numbers = #tpu.dot_dimension_numbers<[1], [0], [0], [1], [0, 0, 1, 1], [], []>} : vector<8x128xf32>, vector<128x384xf32>, vector<8x384xf32> -> vector<8x384xf32>
    %141 = vector.extract_strided_slice %139 {offsets = [0, 0], sizes = [8, 128], strides = [1, 1]} : vector<8x384xf32> to vector<8x128xf32>
    %142 = vector.extract_strided_slice %139 {offsets = [0, 128], sizes = [8, 128], strides = [1, 1]} : vector<8x384xf32> to vector<8x128xf32>
    %143 = vector.extract_strided_slice %139 {offsets = [0, 256], sizes = [8, 128], strides = [1, 1]} : vector<8x384xf32> to vector<8x128xf32>
    %144 = vector.extract_strided_slice %140 {offsets = [0, 0], sizes = [8, 128], strides = [1, 1]} : vector<8x384xf32> to vector<8x128xf32>
    %145 = vector.extract_strided_slice %140 {offsets = [0, 128], sizes = [8, 128], strides = [1, 1]} : vector<8x384xf32> to vector<8x128xf32>
    %146 = vector.extract_strided_slice %140 {offsets = [0, 256], sizes = [8, 128], strides = [1, 1]} : vector<8x384xf32> to vector<8x128xf32>
    %147 = arith.addf %141, %144 : vector<8x128xf32>
    %148 = arith.negf %147 : vector<8x128xf32>
    %149 = math.exp %148 : vector<8x128xf32>
    %cst_50 = arith.constant 1.000000e+00 : f32
    %150 = vector.broadcast %cst_50 : f32 to vector<8x128xf32>
    %151 = arith.addf %150, %149 : vector<8x128xf32>
    %152 = arith.divf %150, %151 : vector<8x128xf32>
    %153 = arith.addf %142, %145 : vector<8x128xf32>
    %154 = arith.negf %153 : vector<8x128xf32>
    %155 = math.exp %154 : vector<8x128xf32>
    %cst_51 = arith.constant 1.000000e+00 : f32
    %156 = vector.broadcast %cst_51 : f32 to vector<8x128xf32>
    %157 = arith.addf %156, %155 : vector<8x128xf32>
    %158 = arith.divf %156, %157 : vector<8x128xf32>
    %159 = arith.addf %146, %18 : vector<8x128xf32>
    %160 = arith.mulf %152, %159 : vector<8x128xf32>
    %161 = arith.addf %143, %160 : vector<8x128xf32>
    %162 = math.tanh %161 : vector<8x128xf32>
    %cst_52 = arith.constant 1.000000e+00 : f32
    %163 = vector.broadcast %cst_52 : f32 to vector<8x128xf32>
    %164 = arith.subf %163, %158 : vector<8x128xf32>
    %165 = arith.mulf %164, %162 : vector<8x128xf32>
    %166 = arith.mulf %158, %137 : vector<8x128xf32>
    %167 = arith.addf %165, %166 : vector<8x128xf32>
    %c32_53 = arith.constant 32 : index
    %c0_54 = arith.constant 0 : index
    %168 = vector.load %arg13[%c32_53, %c0_54] : memref<64x128xf32, #tpu.memory_space<vmem>>, vector<8x128xf32>
    tpu.vector_store %arg13[%c32_53, %c0_54], %167 {strides = array<i32>} : memref<64x128xf32, #tpu.memory_space<vmem>>, vector<8x128xf32>,
    %c40 = arith.constant 40 : index
    %c0_55 = arith.constant 0 : index
    %169 = vector.load %arg12[%c40, %c0_55] : memref<64x384xf32, #tpu.memory_space<vmem>>, vector<8x384xf32>
    %cst_56 = arith.constant dense<0.000000e+00> : vector<8x384xf32>
    %170 = tpu.matmul %167, %15, %cst_56 {dimension_numbers = #tpu.dot_dimension_numbers<[1], [0], [0], [1], [0, 0, 1, 1], [], []>} : vector<8x128xf32>, vector<128x384xf32>, vector<8x384xf32> -> vector<8x384xf32>
    %171 = vector.extract_strided_slice %169 {offsets = [0, 0], sizes = [8, 128], strides = [1, 1]} : vector<8x384xf32> to vector<8x128xf32>
    %172 = vector.extract_strided_slice %169 {offsets = [0, 128], sizes = [8, 128], strides = [1, 1]} : vector<8x384xf32> to vector<8x128xf32>
    %173 = vector.extract_strided_slice %169 {offsets = [0, 256], sizes = [8, 128], strides = [1, 1]} : vector<8x384xf32> to vector<8x128xf32>
    %174 = vector.extract_strided_slice %170 {offsets = [0, 0], sizes = [8, 128], strides = [1, 1]} : vector<8x384xf32> to vector<8x128xf32>
    %175 = vector.extract_strided_slice %170 {offsets = [0, 128], sizes = [8, 128], strides = [1, 1]} : vector<8x384xf32> to vector<8x128xf32>
    %176 = vector.extract_strided_slice %170 {offsets = [0, 256], sizes = [8, 128], strides = [1, 1]} : vector<8x384xf32> to vector<8x128xf32>
    %177 = arith.addf %171, %174 : vector<8x128xf32>
    %178 = arith.negf %177 : vector<8x128xf32>
    %179 = math.exp %178 : vector<8x128xf32>
    %cst_57 = arith.constant 1.000000e+00 : f32
    %180 = vector.broadcast %cst_57 : f32 to vector<8x128xf32>
    %181 = arith.addf %180, %179 : vector<8x128xf32>
    %182 = arith.divf %180, %181 : vector<8x128xf32>
    %183 = arith.addf %172, %175 : vector<8x128xf32>
    %184 = arith.negf %183 : vector<8x128xf32>
    %185 = math.exp %184 : vector<8x128xf32>
    %cst_58 = arith.constant 1.000000e+00 : f32
    %186 = vector.broadcast %cst_58 : f32 to vector<8x128xf32>
    %187 = arith.addf %186, %185 : vector<8x128xf32>
    %188 = arith.divf %186, %187 : vector<8x128xf32>
    %189 = arith.addf %176, %18 : vector<8x128xf32>
    %190 = arith.mulf %182, %189 : vector<8x128xf32>
    %191 = arith.addf %173, %190 : vector<8x128xf32>
    %192 = math.tanh %191 : vector<8x128xf32>
    %cst_59 = arith.constant 1.000000e+00 : f32
    %193 = vector.broadcast %cst_59 : f32 to vector<8x128xf32>
    %194 = arith.subf %193, %188 : vector<8x128xf32>
    %195 = arith.mulf %194, %192 : vector<8x128xf32>
    %196 = arith.mulf %188, %167 : vector<8x128xf32>
    %197 = arith.addf %195, %196 : vector<8x128xf32>
    %c40_60 = arith.constant 40 : index
    %c0_61 = arith.constant 0 : index
    %198 = vector.load %arg13[%c40_60, %c0_61] : memref<64x128xf32, #tpu.memory_space<vmem>>, vector<8x128xf32>
    tpu.vector_store %arg13[%c40_60, %c0_61], %197 {strides = array<i32>} : memref<64x128xf32, #tpu.memory_space<vmem>>, vector<8x128xf32>,
    %c48 = arith.constant 48 : index
    %c0_62 = arith.constant 0 : index
    %199 = vector.load %arg12[%c48, %c0_62] : memref<64x384xf32, #tpu.memory_space<vmem>>, vector<8x384xf32>
    %cst_63 = arith.constant dense<0.000000e+00> : vector<8x384xf32>
    %200 = tpu.matmul %197, %15, %cst_63 {dimension_numbers = #tpu.dot_dimension_numbers<[1], [0], [0], [1], [0, 0, 1, 1], [], []>} : vector<8x128xf32>, vector<128x384xf32>, vector<8x384xf32> -> vector<8x384xf32>
    %201 = vector.extract_strided_slice %199 {offsets = [0, 0], sizes = [8, 128], strides = [1, 1]} : vector<8x384xf32> to vector<8x128xf32>
    %202 = vector.extract_strided_slice %199 {offsets = [0, 128], sizes = [8, 128], strides = [1, 1]} : vector<8x384xf32> to vector<8x128xf32>
    %203 = vector.extract_strided_slice %199 {offsets = [0, 256], sizes = [8, 128], strides = [1, 1]} : vector<8x384xf32> to vector<8x128xf32>
    %204 = vector.extract_strided_slice %200 {offsets = [0, 0], sizes = [8, 128], strides = [1, 1]} : vector<8x384xf32> to vector<8x128xf32>
    %205 = vector.extract_strided_slice %200 {offsets = [0, 128], sizes = [8, 128], strides = [1, 1]} : vector<8x384xf32> to vector<8x128xf32>
    %206 = vector.extract_strided_slice %200 {offsets = [0, 256], sizes = [8, 128], strides = [1, 1]} : vector<8x384xf32> to vector<8x128xf32>
    %207 = arith.addf %201, %204 : vector<8x128xf32>
    %208 = arith.negf %207 : vector<8x128xf32>
    %209 = math.exp %208 : vector<8x128xf32>
    %cst_64 = arith.constant 1.000000e+00 : f32
    %210 = vector.broadcast %cst_64 : f32 to vector<8x128xf32>
    %211 = arith.addf %210, %209 : vector<8x128xf32>
    %212 = arith.divf %210, %211 : vector<8x128xf32>
    %213 = arith.addf %202, %205 : vector<8x128xf32>
    %214 = arith.negf %213 : vector<8x128xf32>
    %215 = math.exp %214 : vector<8x128xf32>
    %cst_65 = arith.constant 1.000000e+00 : f32
    %216 = vector.broadcast %cst_65 : f32 to vector<8x128xf32>
    %217 = arith.addf %216, %215 : vector<8x128xf32>
    %218 = arith.divf %216, %217 : vector<8x128xf32>
    %219 = arith.addf %206, %18 : vector<8x128xf32>
    %220 = arith.mulf %212, %219 : vector<8x128xf32>
    %221 = arith.addf %203, %220 : vector<8x128xf32>
    %222 = math.tanh %221 : vector<8x128xf32>
    %cst_66 = arith.constant 1.000000e+00 : f32
    %223 = vector.broadcast %cst_66 : f32 to vector<8x128xf32>
    %224 = arith.subf %223, %218 : vector<8x128xf32>
    %225 = arith.mulf %224, %222 : vector<8x128xf32>
    %226 = arith.mulf %218, %197 : vector<8x128xf32>
    %227 = arith.addf %225, %226 : vector<8x128xf32>
    %c48_67 = arith.constant 48 : index
    %c0_68 = arith.constant 0 : index
    %228 = vector.load %arg13[%c48_67, %c0_68] : memref<64x128xf32, #tpu.memory_space<vmem>>, vector<8x128xf32>
    tpu.vector_store %arg13[%c48_67, %c0_68], %227 {strides = array<i32>} : memref<64x128xf32, #tpu.memory_space<vmem>>, vector<8x128xf32>,
    %c56 = arith.constant 56 : index
    %c0_69 = arith.constant 0 : index
    %229 = vector.load %arg12[%c56, %c0_69] : memref<64x384xf32, #tpu.memory_space<vmem>>, vector<8x384xf32>
    %cst_70 = arith.constant dense<0.000000e+00> : vector<8x384xf32>
    %230 = tpu.matmul %227, %15, %cst_70 {dimension_numbers = #tpu.dot_dimension_numbers<[1], [0], [0], [1], [0, 0, 1, 1], [], []>} : vector<8x128xf32>, vector<128x384xf32>, vector<8x384xf32> -> vector<8x384xf32>
    %231 = vector.extract_strided_slice %229 {offsets = [0, 0], sizes = [8, 128], strides = [1, 1]} : vector<8x384xf32> to vector<8x128xf32>
    %232 = vector.extract_strided_slice %229 {offsets = [0, 128], sizes = [8, 128], strides = [1, 1]} : vector<8x384xf32> to vector<8x128xf32>
    %233 = vector.extract_strided_slice %229 {offsets = [0, 256], sizes = [8, 128], strides = [1, 1]} : vector<8x384xf32> to vector<8x128xf32>
    %234 = vector.extract_strided_slice %230 {offsets = [0, 0], sizes = [8, 128], strides = [1, 1]} : vector<8x384xf32> to vector<8x128xf32>
    %235 = vector.extract_strided_slice %230 {offsets = [0, 128], sizes = [8, 128], strides = [1, 1]} : vector<8x384xf32> to vector<8x128xf32>
    %236 = vector.extract_strided_slice %230 {offsets = [0, 256], sizes = [8, 128], strides = [1, 1]} : vector<8x384xf32> to vector<8x128xf32>
    %237 = arith.addf %231, %234 : vector<8x128xf32>
    %238 = arith.negf %237 : vector<8x128xf32>
    %239 = math.exp %238 : vector<8x128xf32>
    %cst_71 = arith.constant 1.000000e+00 : f32
    %240 = vector.broadcast %cst_71 : f32 to vector<8x128xf32>
    %241 = arith.addf %240, %239 : vector<8x128xf32>
    %242 = arith.divf %240, %241 : vector<8x128xf32>
    %243 = arith.addf %232, %235 : vector<8x128xf32>
    %244 = arith.negf %243 : vector<8x128xf32>
    %245 = math.exp %244 : vector<8x128xf32>
    %cst_72 = arith.constant 1.000000e+00 : f32
    %246 = vector.broadcast %cst_72 : f32 to vector<8x128xf32>
    %247 = arith.addf %246, %245 : vector<8x128xf32>
    %248 = arith.divf %246, %247 : vector<8x128xf32>
    %249 = arith.addf %236, %18 : vector<8x128xf32>
    %250 = arith.mulf %242, %249 : vector<8x128xf32>
    %251 = arith.addf %233, %250 : vector<8x128xf32>
    %252 = math.tanh %251 : vector<8x128xf32>
    %cst_73 = arith.constant 1.000000e+00 : f32
    %253 = vector.broadcast %cst_73 : f32 to vector<8x128xf32>
    %254 = arith.subf %253, %248 : vector<8x128xf32>
    %255 = arith.mulf %254, %252 : vector<8x128xf32>
    %256 = arith.mulf %248, %227 : vector<8x128xf32>
    %257 = arith.addf %255, %256 : vector<8x128xf32>
    %c56_74 = arith.constant 56 : index
    %c0_75 = arith.constant 0 : index
    %258 = vector.load %arg13[%c56_74, %c0_75] : memref<64x128xf32, #tpu.memory_space<vmem>>, vector<8x128xf32>
    tpu.vector_store %arg13[%c56_74, %c0_75], %257 {strides = array<i32>} : memref<64x128xf32, #tpu.memory_space<vmem>>, vector<8x128xf32>,
    %c0_76 = arith.constant 0 : index
    %c0_77 = arith.constant 0 : index
    %259 = vector.load %arg13[%c0_76, %c0_77] : memref<64x128xf32, #tpu.memory_space<vmem>>, vector<64x128xf32>
    %c0_78 = arith.constant 0 : index
    %c0_79 = arith.constant 0 : index
    %260 = vector.load %arg9[%c0_78, %c0_79] : memref<128x128xf32, #tpu.memory_space<vmem>>, vector<128x128xf32>
    %cst_80 = arith.constant dense<0.000000e+00> : vector<64x128xf32>
    %261 = tpu.matmul %259, %260, %cst_80 {dimension_numbers = #tpu.dot_dimension_numbers<[1], [0], [0], [1], [0, 0, 1, 1], [], []>} : vector<64x128xf32>, vector<128x128xf32>, vector<64x128xf32> -> vector<64x128xf32>
    %c0_81 = arith.constant 0 : index
    %c0_82 = arith.constant 0 : index
    %262 = vector.load %arg10[%c0_81, %c0_82] : memref<1x128xf32, #tpu.memory_space<vmem>>, vector<1x128xf32>
    %263 = vector.broadcast %262 : vector<1x128xf32> to vector<64x128xf32>
    %264 = arith.addf %261, %263 : vector<64x128xf32>
    %265 = vector.shape_cast %264 : vector<64x128xf32> to vector<8x8x128xf32>
    %c0_83 = arith.constant 0 : index
    %c0_84 = arith.constant 0 : index
    %c0_85 = arith.constant 0 : index
    %266 = vector.load %arg11[%c0_83, %c0_84, %c0_85] : memref<8x8x128xf32, #tpu.memory_space<vmem>>, vector<8x8x128xf32>
    tpu.vector_store %arg11[%c0_83, %c0_84, %c0_85], %265 {strides = array<i32>} : memref<8x8x128xf32, #tpu.memory_space<vmem>>, vector<8x8x128xf32>,
    return
  }
  func.func @transform_0(%arg0: i32) -> (i32, i32, i32) {
    %c0_i32 = arith.constant 0 : i32
    %c0_i32_0 = arith.constant 0 : i32
    %c0_i32_1 = arith.constant 0 : i32
    return %c0_i32, %arg0, %c0_i32_0 : i32, i32, i32
  }
  func.func @transform_1(%arg0: i32) -> (i32, i32) {
    %c0_i32 = arith.constant 0 : i32
    %c0_i32_0 = arith.constant 0 : i32
    return %arg0, %c0_i32 : i32, i32
  }
  func.func @transform_2(%arg0: i32) -> (i32, i32) {
    %c0_i32 = arith.constant 0 : i32
    %c0_i32_0 = arith.constant 0 : i32
    %c0_i32_1 = arith.constant 0 : i32
    return %c0_i32, %c0_i32_0 : i32, i32
  }
  func.func @transform_3(%arg0: i32) -> (i32, i32) {
    %c0_i32 = arith.constant 0 : i32
    %c0_i32_0 = arith.constant 0 : i32
    %c0_i32_1 = arith.constant 0 : i32
    return %c0_i32, %c0_i32_0 : i32, i32
  }
  func.func @transform_4(%arg0: i32) -> (i32, i32) {
    %c0_i32 = arith.constant 0 : i32
    %c0_i32_0 = arith.constant 0 : i32
    %c0_i32_1 = arith.constant 0 : i32
    return %c0_i32, %c0_i32_0 : i32, i32
  }
  func.func @transform_5(%arg0: i32) -> (i32, i32) {
    %c0_i32 = arith.constant 0 : i32
    %c0_i32_0 = arith.constant 0 : i32
    %c0_i32_1 = arith.constant 0 : i32
    return %c0_i32, %c0_i32_0 : i32, i32
  }
  func.func @transform_6(%arg0: i32) -> (i32, i32) {
    %c0_i32 = arith.constant 0 : i32
    %c0_i32_0 = arith.constant 0 : i32
    %c0_i32_1 = arith.constant 0 : i32
    return %c0_i32, %c0_i32_0 : i32, i32
  }
  func.func @transform_7(%arg0: i32) -> (i32, i32) {
    %c0_i32 = arith.constant 0 : i32
    %c0_i32_0 = arith.constant 0 : i32
    %c0_i32_1 = arith.constant 0 : i32
    return %c0_i32, %c0_i32_0 : i32, i32
  }
  func.func @transform_8(%arg0: i32) -> (i32, i32) {
    %c0_i32 = arith.constant 0 : i32
    %c0_i32_0 = arith.constant 0 : i32
    %c0_i32_1 = arith.constant 0 : i32
    return %c0_i32, %c0_i32_0 : i32, i32
  }
  func.func @transform_9(%arg0: i32) -> (i32, i32) {
    %c0_i32 = arith.constant 0 : i32
    %c0_i32_0 = arith.constant 0 : i32
    %c0_i32_1 = arith.constant 0 : i32
    return %c0_i32, %c0_i32_0 : i32, i32
  }
  func.func @transform_10(%arg0: i32) -> (i32, i32, i32) {
    %c0_i32 = arith.constant 0 : i32
    %c0_i32_0 = arith.constant 0 : i32
    %c0_i32_1 = arith.constant 0 : i32
    return %c0_i32, %arg0, %c0_i32_0 : i32, i32, i32
  }
}

</mosaic_0001>

<bundles_post_ra>
// kernel: _lambda_.1
= control target key start
LH: loop header
LB: loop body
LE: loop exit
PB: predicated region body
PF: predicated region fallthrough
CT: control target
= control target key end

     0   :  { %15 = vsyncpa [#allocation5], 0  ;;  %s2554_s0 = inlined_call_operand.vmem [shape: f32[8,8,64], index: 0, kind: input, shape index: {}]   ;;  %s2555_s1 = inlined_call_operand.vmem [shape: f32[8,32], index: 1, kind: input, shape index: {}]   ;;  %s2556_s2 = inlined_call_operand.vmem [shape: f32[32,128], index: 2, kind: input, shape index: {}]   ;;  %s2557_s3 = inlined_call_operand.vmem [shape: f32[1,128], index: 3, kind: input, shape index: {}]   ;;  %s2558_s4 = inlined_call_operand.hbm [shape: f32[64,384], index: 4, kind: input, shape index: {}]   ;;  %s2559_s5 = inlined_call_operand.hbm [shape: f32[128,384], index: 5, kind: input, shape index: {}]   ;;  %s2560_s6 = inlined_call_operand.vmem [shape: f32[1,384], index: 6, kind: input, shape index: {}]   ;;  %s2561_s7 = inlined_call_operand.vmem [shape: f32[1,128], index: 7, kind: input, shape index: {}]   ;;  %s2562_s8 = inlined_call_operand.vmem [shape: f32[128,128], index: 8, kind: input, shape index: {}]   ;;  %s2563_s9 = inlined_call_operand.vmem [shape: f32[1,128], index: 9, kind: input, shape index: {}]   ;;  %s2564_s10 = inlined_call_operand.vmem [shape: f32[8,8,128], index: 10, kind: output, shape index: {}]  }
   0x1   :  { %s29_s15 = sshll.u32 %s2558_s4, 4  ;;  %s30_s15 = int_to_ptr.hbm [resolvable:$true] %s29_s15 }
   0x2   :  { %16 = vsyncpa [#allocation7], 0  ;;  %s1583_s16 = smov [#allocation4]   ;;  %s42_s20 = sshll.u32 %s2559_s5, 4  ;;  %s43_s20 = int_to_ptr.hbm [resolvable:$true] %s42_s20 }
   0x3   :  { %s31_s17 = sshll.u32 %s1583_s16, 4  ;;  %s1584_s21 = smov 384   ;;  %s32_s17 = int_to_ptr.vmem [resolvable:$true] %s31_s17 }
   0x4   :  { %s1585_s22 = smov 24   ;;  %s1586_s23 = smov [#allocation6]  }
   0x5   :  { %37 = dma.hbm_to_vmem [thread:$0]  %s30_s15, 3072, %s32_s17, [#allocation5], %s1584_s21, %s1584_s21, %s1585_s22  }
   0x6   :  { %s44_s24 = sshll.u32 %s1586_s23, 4  ;;  %s45_s24 = int_to_ptr.vmem [resolvable:$true] %s44_s24 }
   0x7   :  { %50 = dma.hbm_to_vmem [thread:$0]  %s43_s20, 6144, %s45_s24, [#allocation7], %s1584_s21, %s1584_s21, %s1585_s22  }
   0x8   :  { %1579 = dma.done.wait [#allocation5], 3072  }
   0x9   :  { %1580 = vsyncadd [#allocation5], 4294964224 }
   0xa   :  { %1581 = dma.done.wait [#allocation7], 6144  }
   0xb   :  { %1582 = vsyncadd [#allocation7], 4294961152  ;;  %v71_v0 = vld [vmem:[%s2556_s2 + $0x18] sm:$0xff]  ;;  %v70_v1 = vld [vmem:[%s2556_s2 + $0x10] sm:$0xff]  ;;  %vm76_vm0 = vcmask 261120   ;;  %vm141_vm1 = vcmask 523264  }
   0xc   :  { %92 = vmatpush.msra.mxu0 %v71_v0  ;;  %v130_v2 = vld [vmem:[#allocation4 + $0xa8] sm:$0xff]  ;;  %v127_v4 = vld [vmem:[#allocation4 + $0x90] sm:$0xff]  ;;  %v124_v5 = vld [vmem:[#allocation4 + $0x78] sm:$0xff] }
   0xd   :  { %v69_v3 = vld [vmem:[%s2556_s2 + $0x8] sm:$0xff]  ;;  %174 = vmatpush.msra.mxu1 %v130_v2  ;;  %v132_v6 = vld [vmem:[#allocation4 + $0xb8] sm:$0xff]  ;;  %v68_v7 = vld [vmem:[%s2556_s2] sm:$0xff] }
   0xe   :  { %93 = vmatpush.msra.mxu0 %v70_v1  ;;  %1385 = vmatpush.msra.mxu3 %v132_v6  ;;  %v67_v8 = vld [vmem:[%s2555_s1] sm:$0xff]  ;;  %v118_v11 = vld [vmem:[#allocation4 + $0x48] sm:$0xff]  ;;  %v115_v13 = vld [vmem:[#allocation4 + $0x30] sm:$0xff] }
   0xf   :  { %175 = vmatpush.msra.mxu1 %v127_v4  ;;  %v121_v9 = vld [vmem:[#allocation4 + $0x60] sm:$0xff]  ;;  %v126_v12 = vld [vmem:[#allocation4 + $0x88] sm:$0xff]  ;;  %v123_v14 = vld [vmem:[#allocation4 + $0x70] sm:$0xff] }
  0x10   :  { %94 = vmatpush.msra.mxu0 %v69_v3  ;;  %v129_v10 = vld [vmem:[#allocation4 + $0xa0] sm:$0xff]  ;;  %v112_v15 = vld [vmem:[#allocation4 + $0x18] sm:$0xff]  ;;  %v114_v21 = vld [vmem:[#allocation4 + $0x28] sm:$0xff] }
  0x11   :  { %176 = vmatpush.msra.mxu1 %v124_v5  ;;  %1386 = vmatpush.msra.mxu3 %v129_v10  ;;  %v120_v16 = vld [vmem:[#allocation4 + $0x58] sm:$0xff]  ;;  %v109_v17 = vld [vmem:[#allocation4] sm:$0xff]  ;;  %v111_v23 = vld [vmem:[#allocation4 + $0x10] sm:$0xff] }
  0x12   :  { %95 = vmatpush.msra.mxu0 %v68_v7  ;;  %v1666_v18 = vld [vmem:[%s2554_s0] sm:$0xff]  ;;  %v1668_v20 = vld [vmem:[#allocation6 + $0x178] sm:$0xff]  ;;  %v1675_v24 = vld [vmem:[#allocation6 + $0x148] sm:$0xff] }
  0x13   :  { %1344 = vmatmul.msk.f32.vlgmr.msra.gmra.mxu0 %vm76_vm0, %v67_v8  ;;  %177 = vmatpush.msra.mxu1 %v121_v9  ;;  %v117_v19 = vld [vmem:[#allocation4 + $0x40] sm:$0xff]  ;;  %v1683_v26 = vld [vmem:[#allocation6 + $0x168] sm:$0xff]  ;;  %v1685_v27 = vld [vmem:[#allocation6 + $0x130] sm:$0xff] }
  0x14   :  { %256 = vmatpush.msrb.mxu0 %v132_v6  ;;  %1387 = vmatpush.msra.mxu3 %v126_v12  ;;  %v1672_v22 = vld [vmem:[#allocation6 + $0x160] sm:$0xff]  ;;  %v1692_v28 = vld [vmem:[%s2554_s0 + $0x8] sm:$0xff]  ;;  %v1695_v29 = vld [vmem:[#allocation6 + $0x150] sm:$0xff] }
  0x15   :  { %178 = vmatpush.msra.mxu1 %v118_v11  ;;  %v1680_v25 = vld [vmem:[%s2554_s0 + $0x20] sm:$0xff]  ;;  %v1701_v30 = vld [vmem:[#allocation6 + $0x138] sm:$0xff]  ;;  %v1708_v32 = vld [vmem:[#allocation6 + $0x170] sm:$0xff] }
  0x16   :  { %257 = vmatpush.msrb.mxu0 %v129_v10  ;;  %1388 = vmatpush.msra.mxu3 %v123_v14  ;;  %v1705_v31 = vld [vmem:[#allocation6 + $0x118] sm:$0xff]  ;;  %v1711_v33 = vld [vmem:[#allocation6 + $0x100] sm:$0xff]  ;;  %v1715_v35 = vld [vmem:[#allocation6 + $0xe8] sm:$0xff] }
  0x17   :  { %179 = vmatpush.msra.mxu1 %v115_v13  ;;  %v1713_v34 = vld [vmem:[#allocation6 + $0x120] sm:$0xff]  ;;  %v1719_v36 = vld [vmem:[#allocation6 + $0x158] sm:$0xff]  ;;  %v1722_v37 = vld [vmem:[#allocation6 + $0x108] sm:$0xff] }
  0x18   :  { %258 = vmatpush.msrb.mxu0 %v126_v12  ;;  %1389 = vmatpush.msra.mxu3 %v120_v16  ;;  %v1724_v38 = vld [vmem:[#allocation6 + $0xd0] sm:$0xff]  ;;  %v1733_v40 = vld [vmem:[#allocation6 + $0x140] sm:$0xff]  ;;  %v1743_v42 = vld [vmem:[#allocation6 + $0xd8] sm:$0xff] }
  0x19   :  { %180 = vmatpush.msra.mxu1 %v112_v15  ;;  %v1730_v39 = vld [vmem:[%s2554_s0 + $0x10] sm:$0xff]  ;;  %v1747_v44 = vld [vmem:[#allocation6 + $0xb8] sm:$0xff]  ;;  %v1750_v45 = vld [vmem:[#allocation6 + $0x128] sm:$0xff] }
  0x1a   :  { %259 = vmatpush.msrb.mxu0 %v123_v14  ;;  %1390 = vmatpush.msra.mxu3 %v117_v19  ;;  %v1736_v41 = vld [vmem:[#allocation6 + $0xf0] sm:$0xff]  ;;  %v128_v46 = vld [vmem:[#allocation4 + $0x98] sm:$0xff]  ;;  %v1752_v47 = vld [vmem:[#allocation6 + $0xa0] sm:$0xff] }
  0x1b   :  { %181 = vmatpush.msra.mxu1 %v109_v17  ;;  %v131_v43 = vld [vmem:[#allocation4 + $0xb0] sm:$0xff]  ;;  %v1754_v48 = vld [vmem:[#allocation6 + $0xc0] sm:$0xff]  ;;  %v1762_v50 = vld [vmem:[%s2554_s0 + $0x28] sm:$0xff] }
  0x1c   :  { %1345 = vmatmul.msk.f32.vlgmr.msra.gmra.mxu1 %vm141_vm1, %v1666_v18  ;;  %260 = vmatpush.msrb.mxu0 %v120_v16  ;;  %v125_v49 = vld [vmem:[#allocation4 + $0x80] sm:$0xff]  ;;  %v1764_v51 = vld [vmem:[#allocation6 + $0x88] sm:$0xff]  ;;  %v1774_v53 = vld [vmem:[%s2554_s0 + $0x18] sm:$0xff] }
  0x1d   :  { %408 = vmatpush.msrb.mxu1 %v1668_v20  ;;  %1391 = vmatpush.msra.mxu3 %v114_v21  ;;  %v1766_v52 = vld [vmem:[#allocation6 + $0xa8] sm:$0xff]  ;;  %v1777_v54 = vld [vmem:[#allocation6 + $0x110] sm:$0xff]  ;;  %v1786_v56 = vld [vmem:[#allocation6 + $0x78] sm:$0xff] }
  0x1e   :  { %261 = vmatpush.msrb.mxu0 %v117_v19  ;;  %215 = vmatpush.msra.mxu2 %v131_v43  ;;  %v1779_v55 = vld [vmem:[#allocation6 + $0x90] sm:$0xff]  ;;  %v1790_v57 = vld [vmem:[#allocation6 + $0xf8] sm:$0xff]  ;;  %v1794_v58 = vld [vmem:[#allocation6 + $0x60] sm:$0xff] }
  0x1f   :  { %409 = vmatpush.msrb.mxu1 %v1672_v22  ;;  %1392 = vmatpush.msra.mxu3 %v111_v23  ;;  %v1796_v59 = vld [vmem:[#allocation6 + $0xe0] sm:$0xff]  ;;  %v1802_v60 = vld [vmem:[%s2554_s0 + $0x30] sm:$0xff]  ;;  %v1805_v61 = vld [vmem:[#allocation6 + $0x48] sm:$0xff] }
  0x20   :  { %262 = vmatpush.msrb.mxu0 %v114_v21  ;;  %1365 = vmatmul.msk.f32.vlgmr.msra.gmra.mxu3 %vm141_vm1, %v1680_v25  ;;  %v1810_v62 = vld [vmem:[#allocation6 + $0x30] sm:$0xff]  ;;  %v1815_v63 = vld [vmem:[#allocation6 + $0x18] sm:$0xff]  ;;  %v1820_v0 = vld [vmem:[#allocation6] sm:$0xff] }
  0x21   :  { %410 = vmatpush.msrb.mxu1 %v1675_v24  ;;  %500 = vmatpush.msrb.mxu3 %v1708_v32  ;;  %2587 = vst [vmem:[#allocation10_spill] sm:$0xff] %v1810_v62  ;;  %v122_v1 = vld [vmem:[#allocation4 + $0x68] sm:$0xff]  ;;  %v1837_v3 = vld [vmem:[#allocation6 + $0x70] sm:$0xff]  ;;  %v1843_v4 = vld [vmem:[%s2554_s0 + $0x38] sm:$0xff] }
  0x22   :  { %263 = vmatpush.msrb.mxu0 %v111_v23  ;;  %216 = vmatpush.msra.mxu2 %v128_v46  ;;  %2588 = vst [vmem:[#allocation11_spill] sm:$0xff] %v1815_v63  ;;  %v1835_v2 = vld [vmem:[#allocation6 + $0xc8] sm:$0xff]  ;;  %v119_v5 = vld [vmem:[#allocation4 + $0x50] sm:$0xff]  ;;  %v1848_v7 = vld [vmem:[#allocation6 + $0x58] sm:$0xff] }
  0x23   :  { %411 = vmatpush.msrb.mxu1 %v1685_v27  ;;  %1361 = vmatmul.msk.f32.vlgmr.msrb.gmra.mxu0 %vm141_vm1, %v1666_v18  ;;  %2589 = vst [vmem:[#allocation12_spill] sm:$0xff] %v1820_v0  ;;  %v1846_v6 = vld [vmem:[#allocation6 + $0xb0] sm:$0xff]  ;;  %v116_v8 = vld [vmem:[#allocation4 + $0x38] sm:$0xff]  ;;  %v1855_v10 = vld [vmem:[#allocation6 + $0x40] sm:$0xff] }
  0x24   :  { %368 = vmatpush.msra.mxu0 %v1683_v26  ;;  %1346 = vmatmul.msk.f32.gmra.mxu1 %vm141_vm1, %v1692_v28  ;;  %v1853_v9 = vld [vmem:[#allocation6 + $0x98] sm:$0xff]  ;;  %2590 = vst [vmem:[#allocation13_spill] sm:$0xff] %v1855_v10  ;;  %v113_v11 = vld [vmem:[#allocation4 + $0x20] sm:$0xff]  ;;  %v1861_v13 = vld [vmem:[#allocation6 + $0x28] sm:$0xff] }
  0x25   :  { %412 = vmatpush.msrb.mxu1 %v1705_v31  ;;  %501 = vmatpush.msrb.mxu3 %v1719_v36  ;;  %v1859_v12 = vld [vmem:[#allocation6 + $0x80] sm:$0xff]  ;;  %2591 = vst [vmem:[#allocation14_spill] sm:$0xff] %v1861_v13  ;;  %v110_v14 = vld [vmem:[#allocation4 + $0x8] sm:$0xff]  ;;  %v1868_v16 = vld [vmem:[#allocation6 + $0x10] sm:$0xff] }
  0x26   :  { %369 = vmatpush.msra.mxu0 %v1695_v29  ;;  %217 = vmatpush.msra.mxu2 %v125_v49  ;;  %v1866_v15 = vld [vmem:[#allocation6 + $0x68] sm:$0xff]  ;;  %2592 = vst [vmem:[#allocation15_spill] sm:$0xff] %v1868_v16  ;;  %v1876_v17 = vld [vmem:[#allocation6 + $0x50] sm:$0xff]  ;;  %v1880_v19 = vld [vmem:[#allocation6 + $0x38] sm:$0xff] }
  0x27   :  { %413 = vmatpush.msrb.mxu1 %v1711_v33  ;;  %502 = vmatpush.msrb.mxu3 %v1733_v40  ;;  %2593 = vst [vmem:[#allocation16_spill] sm:$0xff] %v1880_v19  ;;  %v1885_v21 = vld [vmem:[#allocation6 + $0x20] sm:$0xff] }
  0x28   :  { %370 = vmatpush.msra.mxu0 %v1701_v30  ;;  %1366 = vmatmul.msk.f32.gmra.mxu3 %vm141_vm1, %v1762_v50  ;;  %2594 = vst [vmem:[#allocation17_spill] sm:$0xff] %v1885_v21  ;;  %v1397_v23 = vld [vmem:[%s2557_s3] ss:$0 sm:$0xff] }
  0x29   :  { %414 = vmatpush.msrb.mxu1 %v1715_v35  ;;  %503 = vmatpush.msrb.mxu3 %v1750_v45 }
  0x2a   :  { %371 = vmatpush.msra.mxu0 %v1713_v34  ;;  %218 = vmatpush.msra.mxu2 %v122_v1 }
  0x2b   :  { %415 = vmatpush.msrb.mxu1 %v1724_v38  ;;  %1362 = vmatmul.msk.f32.gmra.mxu0 %vm141_vm1, %v1692_v28 }
  0x2c   :  { %372 = vmatpush.msra.mxu0 %v1722_v37  ;;  %1347 = vmatmul.msk.f32.gmra.mxu1 %vm141_vm1, %v1730_v39 }
  0x2d   :  { %416 = vmatpush.msrb.mxu1 %v1747_v44  ;;  %504 = vmatpush.msrb.mxu3 %v1777_v54 }
  0x2e   :  { %373 = vmatpush.msra.mxu0 %v1736_v41  ;;  %219 = vmatpush.msra.mxu2 %v119_v5 }
  0x2f   :  { %417 = vmatpush.msrb.mxu1 %v1752_v47  ;;  %505 = vmatpush.msrb.mxu3 %v1790_v57 }
  0x30   :  { %374 = vmatpush.msra.mxu0 %v1743_v42  ;;  %1367 = vmatmul.msk.f32.gmra.mxu3 %vm141_vm1, %v1802_v60 }
  0x31   :  { %418 = vmatpush.msrb.mxu1 %v1764_v51  ;;  %506 = vmatpush.msrb.mxu3 %v1796_v59 }
  0x32   :  { %375 = vmatpush.msra.mxu0 %v1754_v48  ;;  %220 = vmatpush.msra.mxu2 %v116_v8  ;;  %v133_v8 = vld [vmem:[%s2560_s6] sm:$0x7] }
  0x33   :  { %1363 = vmatmul.msk.f32.gmra.mxu0 %vm141_vm1, %v1730_v39  ;;  %419 = vmatpush.msrb.mxu1 %v1837_v3 }
  0x34   :  { %376 = vmatpush.msra.mxu0 %v1766_v52  ;;  %1348 = vmatmul.msk.f32.gmra.mxu1 %vm141_vm1, %v1774_v53 }
  0x35   :  { %507 = vmatpush.msrb.mxu3 %v1835_v2  ;;  %420 = vmatpush.msrb.mxu1 %v1848_v7 }
  0x36   :  { %377 = vmatpush.msra.mxu0 %v1779_v55  ;;  %221 = vmatpush.msra.mxu2 %v113_v11  ;;  %v2048_v11 = vperm.slane %v133_v8, 0 }
  0x37   :  { %508 = vmatpush.msrb.mxu3 %v1846_v6  ;;  %421 = vmatpush.msrb.mxu1 %v1855_v10 }
  0x38   :  { %378 = vmatpush.msra.mxu0 %v1786_v56  ;;  %222 = vmatpush.msra.mxu2 %v110_v14  ;;  %2603 = vst [vmem:[#allocation26_spill] sm:$0xff] %v2048_v11 }
  0x39   :  { %509 = vmatpush.msrb.mxu3 %v1853_v9  ;;  %422 = vmatpush.msrb.mxu1 %v1861_v13 }
  0x3a   :  { %379 = vmatpush.msra.mxu0 %v1794_v58  ;;  %1353 = vmatmul.msk.f32.vlgmr.msra.gmra.mxu2 %vm141_vm1, %v1666_v18  ;;  %v1892_v18 = vld [vmem:[#allocation6 + $0x8] sm:$0xff] }
  0x3b   :  { %1364 = vmatmul.msk.f32.gmra.mxu0 %vm141_vm1, %v1774_v53  ;;  %510 = vmatpush.msrb.mxu3 %v1859_v12  ;;  %2595 = vst [vmem:[#allocation18_spill] sm:$0xff] %v1892_v18 }
  0x3c   :  { %380 = vmatpush.msra.mxu0 %v1805_v61  ;;  %1349 = vmatmul.msk.f32.gmra.mxu1 %vm141_vm1, %v1680_v25 }
  0x3d   :  { %423 = vmatpush.msrb.mxu1 %v1868_v16  ;;  %511 = vmatpush.msrb.mxu3 %v1866_v15 }
  0x3e   :  { %381 = vmatpush.msra.mxu0 %v1810_v62  ;;  %480 = vmatpush.msrb.mxu2 %v1683_v26 }
  0x3f   :  { %1368 = vmatmul.msk.f32.gmra.mxu3 %vm141_vm1, %v1843_v4  ;;  %592 = vmatpush.msra.mxu1 %v1683_v26 }
  0x40   :  { %382 = vmatpush.msra.mxu0 %v1815_v63  ;;  %481 = vmatpush.msrb.mxu2 %v1695_v29 }
  0x41   :  { %512 = vmatpush.msrb.mxu3 %v1876_v17  ;;  %593 = vmatpush.msra.mxu1 %v1695_v29 }
  0x42   :  { %383 = vmatpush.msra.mxu0 %v1820_v0  ;;  %482 = vmatpush.msrb.mxu2 %v1701_v30 }
  0x43   :  { %513 = vmatpush.msrb.mxu3 %v1880_v19  ;;  %594 = vmatpush.msra.mxu1 %v1701_v30 }
  0x44   :  { %388 = vmatpush.msrb.mxu0 %v1708_v32  ;;  %1350 = vmatmul.msk.f32.gmra.mxu1 %vm141_vm1, %v1762_v50 }
  0x45   :  { %483 = vmatpush.msrb.mxu2 %v1713_v34  ;;  %514 = vmatpush.msrb.mxu3 %v1885_v21 }
  0x46   :  { %389 = vmatpush.msrb.mxu0 %v1719_v36  ;;  %1354 = vmatmul.msk.f32.gmra.mxu2 %vm141_vm1, %v1692_v28 }
  0x47   :  { %484 = vmatpush.msrb.mxu2 %v1722_v37  ;;  %595 = vmatpush.msra.mxu1 %v1713_v34 }
  0x48   :  { %390 = vmatpush.msrb.mxu0 %v1733_v40  ;;  %515 = vmatpush.msrb.mxu3 %v1892_v18 }
  0x49   :  { %485 = vmatpush.msrb.mxu2 %v1736_v41  ;;  %596 = vmatpush.msra.mxu1 %v1722_v37 }
  0x4a   :  { %391 = vmatpush.msrb.mxu0 %v1750_v45  ;;  %632 = vmatpush.msra.mxu3 %v1668_v20 }
  0x4b   :  { %486 = vmatpush.msrb.mxu2 %v1743_v42  ;;  %597 = vmatpush.msra.mxu1 %v1736_v41 }
  0x4c   :  { %392 = vmatpush.msrb.mxu0 %v1777_v54  ;;  %1351 = vmatmul.msk.f32.gmra.mxu1 %vm141_vm1, %v1802_v60 }
  0x4d   :  { %633 = vmatpush.msra.mxu3 %v1672_v22  ;;  %487 = vmatpush.msrb.mxu2 %v1754_v48 }
  0x4e   :  { %393 = vmatpush.msrb.mxu0 %v1790_v57  ;;  %1355 = vmatmul.msk.f32.gmra.mxu2 %vm141_vm1, %v1730_v39 }
  0x4f   :  { %634 = vmatpush.msra.mxu3 %v1675_v24  ;;  %598 = vmatpush.msra.mxu1 %v1743_v42 }
  0x50   :  { %394 = vmatpush.msrb.mxu0 %v1796_v59  ;;  %488 = vmatpush.msrb.mxu2 %v1766_v52 }
  0x51   :  { %635 = vmatpush.msra.mxu3 %v1685_v27  ;;  %599 = vmatpush.msra.mxu1 %v1754_v48 }
  0x52   :  { %395 = vmatpush.msrb.mxu0 %v1835_v2  ;;  %489 = vmatpush.msrb.mxu2 %v1779_v55 }
  0x53   :  { %636 = vmatpush.msra.mxu3 %v1705_v31  ;;  %600 = vmatpush.msra.mxu1 %v1766_v52 }
  0x54   :  { %1352 = vmatmul.msk.f32.gmra.mxu1 %vm141_vm1, %v1843_v4  ;;  %396 = vmatpush.msrb.mxu0 %v1846_v6 }
  0x55   :  { %490 = vmatpush.msrb.mxu2 %v1786_v56  ;;  %637 = vmatpush.msra.mxu3 %v1711_v33 }
  0x56   :  { %397 = vmatpush.msrb.mxu0 %v1853_v9  ;;  %601 = vmatpush.msra.mxu1 %v1779_v55 }
  0x57   :  { %491 = vmatpush.msrb.mxu2 %v1794_v58  ;;  %638 = vmatpush.msra.mxu3 %v1715_v35 }
  0x58   :  { %398 = vmatpush.msrb.mxu0 %v1859_v12  ;;  %1356 = vmatmul.msk.f32.gmra.mxu2 %vm141_vm1, %v1774_v53 }
  0x59   :  { %602 = vmatpush.msra.mxu1 %v1786_v56  ;;  %492 = vmatpush.msrb.mxu2 %v1805_v61 }
  0x5a   :  { %399 = vmatpush.msrb.mxu0 %v1866_v15  ;;  %639 = vmatpush.msra.mxu3 %v1724_v38 }
  0x5b   :  { %603 = vmatpush.msra.mxu1 %v1794_v58  ;;  %493 = vmatpush.msrb.mxu2 %v1810_v62 }
  0x5c   :  { %400 = vmatpush.msrb.mxu0 %v1876_v17  ;;  %640 = vmatpush.msra.mxu3 %v1747_v44 }
  0x5d   :  { %604 = vmatpush.msra.mxu1 %v1805_v61  ;;  %494 = vmatpush.msrb.mxu2 %v1815_v63 }
  0x5e   :  { %401 = vmatpush.msrb.mxu0 %v1880_v19  ;;  %641 = vmatpush.msra.mxu3 %v1752_v47 }
  0x5f   :  { %605 = vmatpush.msra.mxu1 %v1810_v62  ;;  %495 = vmatpush.msrb.mxu2 %v1820_v0 }
  0x60   :  { %402 = vmatpush.msrb.mxu0 %v1885_v21  ;;  %1357 = vmatmul.msk.f32.gmra.mxu2 %vm141_vm1, %v1680_v25 }
  0x61   :  { %642 = vmatpush.msra.mxu3 %v1764_v51  ;;  %612 = vmatpush.msra.mxu2 %v1708_v32 }
  0x62   :  { %403 = vmatpush.msrb.mxu0 %v1892_v18  ;;  %606 = vmatpush.msra.mxu1 %v1815_v63 }
  0x63   :  { %643 = vmatpush.msra.mxu3 %v1837_v3  ;;  %613 = vmatpush.msra.mxu2 %v1719_v36 }
  0x64   :  { %607 = vmatpush.msra.mxu1 %v1820_v0 }
  0x65   :  { %644 = vmatpush.msra.mxu3 %v1848_v7  ;;  %614 = vmatpush.msra.mxu2 %v1733_v40 }
  0x67   :  { %645 = vmatpush.msra.mxu3 %v1855_v10  ;;  %615 = vmatpush.msra.mxu2 %v1750_v45 }
  0x68   :  { %1358 = vmatmul.msk.f32.gmra.mxu2 %vm141_vm1, %v1762_v50 }
  0x69   :  { %646 = vmatpush.msra.mxu3 %v1861_v13  ;;  %616 = vmatpush.msra.mxu2 %v1777_v54 }
  0x6b   :  { %647 = vmatpush.msra.mxu3 %v1868_v16  ;;  %617 = vmatpush.msra.mxu2 %v1790_v57 }
  0x6d   :  { %618 = vmatpush.msra.mxu2 %v1796_v59 }
  0x6f   :  { %619 = vmatpush.msra.mxu2 %v1835_v2 }
  0x70   :  { %1359 = vmatmul.msk.f32.gmra.mxu2 %vm141_vm1, %v1802_v60 }
  0x71   :  { %620 = vmatpush.msra.mxu2 %v1846_v6 }
  0x73   :  { %621 = vmatpush.msra.mxu2 %v1853_v9 }
  0x75   :  { %622 = vmatpush.msra.mxu2 %v1859_v12 }
  0x77   :  { %623 = vmatpush.msra.mxu2 %v1866_v15 }
  0x78   :  { %1360 = vmatmul.msk.f32.gmra.mxu2 %vm141_vm1, %v1843_v4 }
  0x79   :  { %624 = vmatpush.msra.mxu2 %v1876_v17 }
  0x7b   :  { %625 = vmatpush.msra.mxu2 %v1880_v19 }
  0x7d   :  { %626 = vmatpush.msra.mxu2 %v1885_v21 }
  0x7f   :  { %627 = vmatpush.msra.mxu2 %v1892_v18 }
  0x90   :  { %v97_v28 = vpop.f32.mrf.mxu0 }
  0x91   :  { %v98_v39 = vadd.f32 %v1397_v23, %v97_v28 }
  0x93   :  { %1400 = vtanh.f32 %v98_v39 }
  0x99   :  { %v1944_v43 = vpop.eup %1400  ;;  %v183_v25 = vpop.f32.mrf.mxu1 }
  0x9a   :  { %384 = vmatmul.f32.vlgmr.msra.gmra.mxu0 %v1944_v43  ;;  %424 = vmatmul.f32.vlgmr.msrb.gmra.mxu1 %v1944_v43  ;;  %v184_v23 = vadd.f32 %v183_v25, %v2048_v11 }
  0x9b   :  { %520 = vmatpush.msra.mxu0 %v1668_v20  ;;  %724 = vmatpush.msrb.mxu1 %v1708_v32 }
  0x9d   :  { %521 = vmatpush.msra.mxu0 %v1672_v22  ;;  %725 = vmatpush.msrb.mxu1 %v1719_v36 }
  0x9f   :  { %522 = vmatpush.msra.mxu0 %v1675_v24  ;;  %726 = vmatpush.msrb.mxu1 %v1733_v40 }
  0xa0   :  { %v265_v49 = vpop.f32.mrf.mxu0 }
  0xa1   :  { %523 = vmatpush.msra.mxu0 %v1685_v27  ;;  %727 = vmatpush.msrb.mxu1 %v1750_v45  ;;  %v2031_v46 = vpop.f32.mrf.mxu1 }
  0xa2   :  { %404 = vmatmul.f32.vlgmr.msrb.gmra.mxu0 %v1944_v43  ;;  %2596 = vst [vmem:[#allocation19_spill] sm:$0xff] %v2031_v46 }
  0xa3   :  { %524 = vmatpush.msra.mxu0 %v1705_v31  ;;  %728 = vmatpush.msrb.mxu1 %v1777_v54 }
  0xa5   :  { %525 = vmatpush.msra.mxu0 %v1711_v33  ;;  %729 = vmatpush.msrb.mxu1 %v1790_v57 }
  0xa7   :  { %526 = vmatpush.msra.mxu0 %v1715_v35  ;;  %730 = vmatpush.msrb.mxu1 %v1796_v59 }
  0xa8   :  { %v2035_v53 = vpop.f32.mrf.mxu0 }
  0xa9   :  { %527 = vmatpush.msra.mxu0 %v1724_v38  ;;  %731 = vmatpush.msrb.mxu1 %v1835_v2  ;;  %v2033_v50 = vpop.f32.mrf.mxu1  ;;  %2598 = vst [vmem:[#allocation21_spill] sm:$0xff] %v2035_v53 }
  0xaa   :  { %2597 = vst [vmem:[#allocation20_spill] sm:$0xff] %v2033_v50  ;;  %v2053_v50 = vperm.slane %v133_v8, 1 }
  0xab   :  { %528 = vmatpush.msra.mxu0 %v1747_v44  ;;  %732 = vmatpush.msrb.mxu1 %v1846_v6 }
  0xac   :  { %2605 = vst [vmem:[#allocation28_spill] sm:$0xff] %v2053_v50 }
  0xad   :  { %529 = vmatpush.msra.mxu0 %v1752_v47  ;;  %733 = vmatpush.msrb.mxu1 %v1853_v9 }
  0xaf   :  { %530 = vmatpush.msra.mxu0 %v1764_v51  ;;  %734 = vmatpush.msrb.mxu1 %v1859_v12 }
  0xb0   :  { %v2039_v1 = vpop.f32.mrf.mxu0 }
  0xb1   :  { %531 = vmatpush.msra.mxu0 %v1837_v3  ;;  %735 = vmatpush.msrb.mxu1 %v1866_v15  ;;  %v2037_v60 = vpop.f32.mrf.mxu1  ;;  %2600 = vst [vmem:[#allocation23_spill] sm:$0xff] %v2039_v1 }
  0xb2   :  { %2599 = vst [vmem:[#allocation22_spill] sm:$0xff] %v2037_v60 }
  0xb3   :  { %532 = vmatpush.msra.mxu0 %v1848_v7  ;;  %736 = vmatpush.msrb.mxu1 %v1876_v17 }
  0xb5   :  { %533 = vmatpush.msra.mxu0 %v1855_v10  ;;  %737 = vmatpush.msrb.mxu1 %v1880_v19 }
  0xb7   :  { %534 = vmatpush.msra.mxu0 %v1861_v13  ;;  %738 = vmatpush.msrb.mxu1 %v1885_v21 }
  0xb8   :  { %v2043_v5 = vpop.f32.mrf.mxu0 }
  0xb9   :  { %535 = vmatpush.msra.mxu0 %v1868_v16  ;;  %739 = vmatpush.msrb.mxu1 %v1892_v18  ;;  %v2041_v4 = vpop.f32.mrf.mxu1  ;;  %2602 = vst [vmem:[#allocation25_spill] sm:$0xff] %v2043_v5 }
  0xba   :  { %2601 = vst [vmem:[#allocation24_spill] sm:$0xff] %v2041_v4 }
  0xbb   :  { %704 = vmatpush.msrb.mxu0 %v1683_v26 }
  0xbd   :  { %705 = vmatpush.msrb.mxu0 %v1695_v29  ;;  %v224_v60 = vpop.f32.mrf.mxu2 }
  0xbe   :  { %v225_v4 = vadd.f32 %v224_v60, %v2053_v50  ;;  %v2063_v60 = vld [vmem:[%s2561_s7] ss:$0 sm:$0xff] }
  0xbf   :  { %706 = vmatpush.msrb.mxu0 %v1701_v30 }
  0xc1   :  { %707 = vmatpush.msrb.mxu0 %v1713_v34  ;;  %v2050_v14 = vpop.f32.mrf.mxu1 }
  0xc2   :  { %2604 = vst [vmem:[#allocation27_spill] sm:$0xff] %v2050_v14 }
  0xc3   :  { %708 = vmatpush.msrb.mxu0 %v1722_v37 }
  0xc5   :  { %709 = vmatpush.msrb.mxu0 %v1736_v41 }
  0xc7   :  { %710 = vmatpush.msrb.mxu0 %v1743_v42 }
  0xc9   :  { %711 = vmatpush.msrb.mxu0 %v1754_v48  ;;  %v2056_v5 = vpop.f32.mrf.mxu1 }
  0xca   :  { %2606 = vst [vmem:[#allocation29_spill] sm:$0xff] %v2056_v5 }
  0xcb   :  { %712 = vmatpush.msrb.mxu0 %v1766_v52 }
  0xcd   :  { %713 = vmatpush.msrb.mxu0 %v1779_v55 }
  0xcf   :  { %714 = vmatpush.msrb.mxu0 %v1786_v56 }
  0xd1   :  { %715 = vmatpush.msrb.mxu0 %v1794_v58  ;;  %v2058_v14 = vpop.f32.mrf.mxu1 }
  0xd2   :  { %2607 = vst [vmem:[#allocation30_spill] sm:$0xff] %v2058_v14 }
  0xd3   :  { %716 = vmatpush.msrb.mxu0 %v1805_v61 }
  0xd5   :  { %717 = vmatpush.msrb.mxu0 %v1810_v62 }
  0xd7   :  { %718 = vmatpush.msrb.mxu0 %v1815_v63 }
  0xd9   :  { %719 = vmatpush.msrb.mxu0 %v1820_v0 }
 0x117   :  { %v385_v28 = vpop.f32.mrf.mxu0 }
 0x118   :  { %v428_v39 = vadd.f32 %v385_v28, %v184_v23 }
 0x11a   :  { %v1369_v1 = vmul.f32 -1.442695, %v428_v39 }
 0x11c   :  { %1402 = vpow2.f32 %v1369_v1 }
 0x11f   :  { %v405_v53 = vpop.f32.mrf.mxu0 }
 0x120   :  { %v448_v46 = vadd.f32 %v405_v53, %v225_v4 }
 0x122   :  { %v1403_v18 = vpop.eup %1402  ;;  %v1370_v0 = vmul.f32 -1.442695, %v448_v46 }
 0x123   :  { %v432_v16 = vadd.f32 1.0, %v1403_v18  ;;  %v425_v18 = vpop.f32.mrf.mxu1 }
 0x124   :  { %1404 = vpow2.f32 %v1370_v0  ;;  %v2065_v0 = vperm.slane %v133_v8, 2 }
 0x125   :  { %1406 = vrcp.f32 %v432_v16  ;;  %v444_v1 = vand.u32 2147483648, %v432_v16  ;;  %v442_v46 = vand.u32 2147483647, %v432_v16  ;;  %vm438_vm3 = vweird.f32 %v432_v16 }
 0x126   :  { %v266_v63 = vadd.f32 %v265_v49, %v2065_v0 }
 0x127   :  { %vm443_vm5 = vcmp.eq.f32.partialorder %v442_v46, 8.507059e+37 }
 0x12a   :  { %v1405_v25 = vpop.eup %1404 }
 0x12b   :  { %v1407_v23 = vpop.eup %1406  ;;  %v452_v28 = vadd.f32 1.0, %v1405_v25  ;;  %v445_v25 = vor.u32 1.1754944e-38, %v444_v1 }
 0x12c   :  { %v434_v11 = vmul.f32 %v1407_v23, %v432_v16  ;;  %vm439_vm2 = vweird.f32 %v1407_v23 }
 0x12d   :  { %1408 = vrcp.f32 %v452_v28  ;;  %vm440_vm4 = vmor %vm438_vm3, %vm439_vm2  ;;  %v464_v19 = vand.u32 2147483648, %v452_v28  ;;  %v462_v8 = vand.u32 2147483647, %v452_v28  ;;  %vm458_vm7 = vweird.f32 %v452_v28 }
 0x12e   :  { %v435_v39 = vsub.f32 1.0, %v434_v11  ;;  %v468_v11 = vadd.f32 %v2063_v60, %v425_v18 }
 0x12f   :  { %v465_v1 = vor.u32 1.1754944e-38, %v464_v19  ;;  %vm463_vm9 = vcmp.eq.f32.partialorder %v462_v8, 8.507059e+37  ;;  %v2612_v19 = vld [vmem:[#allocation11_spill] sm:$0xff]  ;;  %v2129_v8 = vpop.f32.mrf.mxu3 }
 0x130   :  { %v436_v53 = vmul.f32 %v1407_v23, %v435_v39  ;;  %2620 = vst [vmem:[#allocation33_spill] sm:$0xff] %v2129_v8 }
 0x132   :  { %v437_v4 = vadd.f32 %v1407_v23, %v436_v53 }
 0x133   :  { %v1409_v14 = vpop.eup %1408 }
 0x134   :  { %v441_v5 = vsel %vm440_vm4, %v1407_v23, %v437_v4  ;;  %v454_v50 = vmul.f32 %v1409_v14, %v452_v28  ;;  %vm459_vm6 = vweird.f32 %v1409_v14  ;;  %v2616_v28 = vld [vmem:[#allocation18_spill] sm:$0xff]  ;;  %v227_v4 = vpop.f32.mrf.mxu2 }
 0x135   :  { %v446_v21 = vsel %vm443_vm5, %v445_v25, %v441_v5  ;;  %vm460_vm8 = vmor %vm458_vm7, %vm459_vm6 }
 0x136   :  { %v469_v13 = vmul.f32 %v468_v11, %v446_v21  ;;  %v455_v39 = vsub.f32 1.0, %v454_v50  ;;  %v2614_v50 = vld [vmem:[#allocation15_spill] sm:$0xff] }
 0x138   :  { %v470_v62 = vadd.f32 %v469_v13, %v266_v63  ;;  %v456_v10 = vmul.f32 %v1409_v14, %v455_v39  ;;  %v2609_v63 = vld [vmem:[#allocation10_spill] sm:$0xff] }
 0x139   :  { %v2611_v13 = vld [vmem:[#allocation14_spill] sm:$0xff] }
 0x13a   :  { %1410 = vtanh.f32 %v470_v62  ;;  %v457_v16 = vadd.f32 %v1409_v14, %v456_v10  ;;  %v2608_v62 = vld [vmem:[#allocation13_spill] sm:$0xff]  ;;  %v2610_v10 = vld [vmem:[#allocation16_spill] sm:$0xff] }
 0x13c   :  { %v461_v23 = vsel %vm460_vm8, %v1409_v14, %v457_v16  ;;  %v2615_v14 = vld [vmem:[#allocation12_spill] sm:$0xff]  ;;  %v2123_v25 = vpop.f32.mrf.mxu2 }
 0x13d   :  { %v466_v53 = vsel %vm463_vm9, %v465_v1, %v461_v23  ;;  %2617 = vst [vmem:[#allocation13_spill] sm:$0xff] %v2123_v25  ;;  %v2133_v1 = vpop.f32.mrf.mxu3 }
 0x13e   :  { %v472_v46 = vsub.f32 1.0, %v466_v53  ;;  %v474_v49 = vmul.f32 %v1944_v43, %v466_v53  ;;  %v2613_v43 = vld [vmem:[#allocation17_spill] sm:$0xff]  ;;  %2622 = vst [vmem:[#allocation35_spill] sm:$0xff] %v2133_v1 }
 0x140   :  { %v1411_v18 = vpop.eup %1410 }
 0x141   :  { %v473_v5 = vmul.f32 %v1411_v18, %v472_v46 }
 0x143   :  { %v2070_v21 = vadd.f32 %v474_v49, %v473_v5  ;;  %v2627_v5 = vld [vmem:[#allocation26_spill] sm:$0xff]  ;;  %v2628_v49 = vld [vmem:[#allocation19_spill] sm:$0xff] }
 0x144   :  { %v2125_v11 = vpop.f32.mrf.mxu2  ;;  %v187_v25 = vadd.f32 %v2628_v49, %v2627_v5 }
 0x145   :  { %496 = vmatmul.f32.vlgmr.msrb.gmra.mxu2 %v2070_v21  ;;  %516 = vmatmul.f32.vlgmr.msrb.gmra.mxu3 %v2070_v21  ;;  %2618 = vst [vmem:[#allocation31_spill] sm:$0xff] %v2125_v11  ;;  %v2137_v53 = vpop.f32.mrf.mxu3  ;;  %v2629_v11 = vld [vmem:[#allocation28_spill] sm:$0xff] }
 0x146   :  { %536 = vmatmul.f32.vlgmr.msra.gmra.mxu0 %v2070_v21  ;;  %744 = vmatpush.msrb.mxu2 %v1668_v20  ;;  %2624 = vst [vmem:[#allocation37_spill] sm:$0xff] %v2137_v53 }
 0x147   :  { %816 = vmatpush.msrb.mxu3 %v1683_v26  ;;  %836 = vmatpush.msra.mxu0 %v1708_v32 }
 0x148   :  { %745 = vmatpush.msrb.mxu2 %v1672_v22 }
 0x149   :  { %817 = vmatpush.msrb.mxu3 %v1695_v29  ;;  %837 = vmatpush.msra.mxu0 %v1719_v36 }
 0x14a   :  { %746 = vmatpush.msrb.mxu2 %v1675_v24 }
 0x14b   :  { %818 = vmatpush.msrb.mxu3 %v1701_v30  ;;  %838 = vmatpush.msra.mxu0 %v1733_v40 }
 0x14c   :  { %747 = vmatpush.msrb.mxu2 %v1685_v27  ;;  %v2127_v39 = vpop.f32.mrf.mxu2 }
 0x14d   :  { %819 = vmatpush.msrb.mxu3 %v1713_v34  ;;  %839 = vmatpush.msra.mxu0 %v1750_v45  ;;  %2619 = vst [vmem:[#allocation32_spill] sm:$0xff] %v2127_v39  ;;  %v2141_v18 = vpop.f32.mrf.mxu3 }
 0x14e   :  { %748 = vmatpush.msrb.mxu2 %v1705_v31  ;;  %2626 = vst [vmem:[#allocation39_spill] sm:$0xff] %v2141_v18 }
 0x14f   :  { %820 = vmatpush.msrb.mxu3 %v1722_v37  ;;  %840 = vmatpush.msra.mxu0 %v1777_v54 }
 0x150   :  { %749 = vmatpush.msrb.mxu2 %v1711_v33 }
 0x151   :  { %821 = vmatpush.msrb.mxu3 %v1736_v41  ;;  %841 = vmatpush.msra.mxu0 %v1790_v57 }
 0x152   :  { %750 = vmatpush.msrb.mxu2 %v1715_v35 }
 0x153   :  { %822 = vmatpush.msrb.mxu3 %v1743_v42  ;;  %842 = vmatpush.msra.mxu0 %v1796_v59 }
 0x154   :  { %751 = vmatpush.msrb.mxu2 %v1724_v38  ;;  %v2131_v16 = vpop.f32.mrf.mxu2 }
 0x155   :  { %823 = vmatpush.msrb.mxu3 %v1754_v48  ;;  %843 = vmatpush.msra.mxu0 %v1835_v2  ;;  %2621 = vst [vmem:[#allocation34_spill] sm:$0xff] %v2131_v16 }
 0x156   :  { %752 = vmatpush.msrb.mxu2 %v1747_v44 }
 0x157   :  { %824 = vmatpush.msrb.mxu3 %v1766_v52  ;;  %844 = vmatpush.msra.mxu0 %v1846_v6 }
 0x158   :  { %753 = vmatpush.msrb.mxu2 %v1752_v47 }
 0x159   :  { %825 = vmatpush.msrb.mxu3 %v1779_v55  ;;  %845 = vmatpush.msra.mxu0 %v1853_v9 }
 0x15a   :  { %754 = vmatpush.msrb.mxu2 %v1764_v51 }
 0x15b   :  { %826 = vmatpush.msrb.mxu3 %v1786_v56  ;;  %846 = vmatpush.msra.mxu0 %v1859_v12 }
 0x15c   :  { %755 = vmatpush.msrb.mxu2 %v1837_v3  ;;  %v2135_v23 = vpop.f32.mrf.mxu2 }
 0x15d   :  { %827 = vmatpush.msrb.mxu3 %v1794_v58  ;;  %847 = vmatpush.msra.mxu0 %v1866_v15  ;;  %2623 = vst [vmem:[#allocation36_spill] sm:$0xff] %v2135_v23 }
 0x15e   :  { %756 = vmatpush.msrb.mxu2 %v1848_v7 }
 0x15f   :  { %828 = vmatpush.msrb.mxu3 %v1805_v61  ;;  %848 = vmatpush.msra.mxu0 %v1876_v17 }
 0x160   :  { %757 = vmatpush.msrb.mxu2 %v2608_v62 }
 0x161   :  { %829 = vmatpush.msrb.mxu3 %v2609_v63  ;;  %849 = vmatpush.msra.mxu0 %v2610_v10 }
 0x162   :  { %758 = vmatpush.msrb.mxu2 %v2611_v13 }
 0x163   :  { %830 = vmatpush.msrb.mxu3 %v2612_v19  ;;  %850 = vmatpush.msra.mxu0 %v2613_v43 }
 0x164   :  { %759 = vmatpush.msrb.mxu2 %v2614_v50  ;;  %v2139_v46 = vpop.f32.mrf.mxu2 }
 0x165   :  { %831 = vmatpush.msrb.mxu3 %v2615_v14  ;;  %851 = vmatpush.msra.mxu0 %v2616_v28  ;;  %2625 = vst [vmem:[#allocation38_spill] sm:$0xff] %v2139_v46  ;;  %v228_v28 = vadd.f32 %v227_v4, %v2629_v11 }
 0x1c8   :  { %v497_v39 = vpop.f32.mrf.mxu2  ;;  %v517_v14 = vpop.f32.mrf.mxu3 }
 0x1c9   :  { %v540_v8 = vadd.f32 %v497_v39, %v187_v25  ;;  %v560_v50 = vadd.f32 %v517_v14, %v228_v28  ;;  %v537_v28 = vpop.f32.mrf.mxu0 }
 0x1ca   :  { %v580_v39 = vadd.f32 %v2063_v60, %v537_v28 }
 0x1cb   :  { %v1371_v16 = vmul.f32 -1.442695, %v540_v8  ;;  %v1372_v43 = vmul.f32 -1.442695, %v560_v50 }
 0x1cd   :  { %1412 = vpow2.f32 %v1371_v16 }
 0x1ce   :  { %1414 = vpow2.f32 %v1372_v43 }
 0x1d3   :  { %v1413_v23 = vpop.eup %1412 }
 0x1d4   :  { %v1415_v1 = vpop.eup %1414  ;;  %v544_v53 = vadd.f32 1.0, %v1413_v23 }
 0x1d5   :  { %v564_v19 = vadd.f32 1.0, %v1415_v1 }
 0x1d6   :  { %1416 = vrcp.f32 %v544_v53  ;;  %v556_v4 = vand.u32 2147483648, %v544_v53  ;;  %v554_v14 = vand.u32 2147483647, %v544_v53  ;;  %vm550_vm11 = vweird.f32 %v544_v53 }
 0x1d7   :  { %1418 = vrcp.f32 %v564_v19  ;;  %vm570_vm15 = vweird.f32 %v564_v19  ;;  %v574_v63 = vand.u32 2147483647, %v564_v19 }
 0x1d8   :  { %v557_v43 = vor.u32 1.1754944e-38, %v556_v4  ;;  %vm555_vm13 = vcmp.eq.f32.partialorder %v554_v14, 8.507059e+37 }
 0x1d9   :  { %vm575_vm1 = vcmp.eq.f32.partialorder %v574_v63, 8.507059e+37 }
 0x1dc   :  { %v1417_v18 = vpop.eup %1416 }
 0x1dd   :  { %v1419_v46 = vpop.eup %1418  ;;  %v546_v13 = vmul.f32 %v1417_v18, %v544_v53  ;;  %vm551_vm10 = vweird.f32 %v1417_v18 }
 0x1de   :  { %v566_v49 = vmul.f32 %v1419_v46, %v564_v19  ;;  %vm552_vm12 = vmor %vm550_vm11, %vm551_vm10  ;;  %vm571_vm14 = vweird.f32 %v1419_v46 }
 0x1df   :  { %v547_v5 = vsub.f32 1.0, %v546_v13  ;;  %v2630_v13 = vld [vmem:[#allocation21_spill] sm:$0xff]  ;;  %vm572_vm0 = vmor %vm570_vm15, %vm571_vm14 }
 0x1e0   :  { %v567_v11 = vsub.f32 1.0, %v566_v49  ;;  %v269_v23 = vadd.f32 %v2630_v13, %v2065_v0 }
 0x1e1   :  { %v548_v10 = vmul.f32 %v1417_v18, %v547_v5  ;;  %v576_v5 = vand.u32 2147483648, %v564_v19 }
 0x1e2   :  { %v568_v50 = vmul.f32 %v1419_v46, %v567_v11 }
 0x1e3   :  { %v549_v25 = vadd.f32 %v1417_v18, %v548_v10  ;;  %v577_v53 = vor.u32 1.1754944e-38, %v576_v5 }
 0x1e4   :  { %v569_v1 = vadd.f32 %v1419_v46, %v568_v50 }
 0x1e5   :  { %v553_v8 = vsel %vm552_vm12, %v1417_v18, %v549_v25 }
 0x1e6   :  { %v558_v16 = vsel %vm555_vm13, %v557_v43, %v553_v8  ;;  %v573_v10 = vsel %vm572_vm0, %v1419_v46, %v569_v1  ;;  %v2643_v1 = vld [vmem:[#allocation23_spill] sm:$0xff] }
 0x1e7   :  { %v581_v49 = vmul.f32 %v580_v39, %v558_v16  ;;  %v578_v4 = vsel %vm575_vm1, %v577_v53, %v573_v10  ;;  %v272_v13 = vadd.f32 %v2643_v1, %v2065_v0  ;;  %v2303_v1 = vld [vmem:[#allocation6 + $0x78] sm:$0xff] }
 0x1e8   :  { %v584_v28 = vsub.f32 1.0, %v578_v4  ;;  %v586_v50 = vmul.f32 %v578_v4, %v2070_v21 }
 0x1e9   :  { %v582_v11 = vadd.f32 %v581_v49, %v269_v23 }
 0x1eb   :  { %1420 = vtanh.f32 %v582_v11 }
 0x1f1   :  { %v1421_v18 = vpop.eup %1420 }
 0x1f2   :  { %v585_v14 = vmul.f32 %v1421_v18, %v584_v28 }
 0x1f4   :  { %v2150_v25 = vadd.f32 %v586_v50, %v585_v14 }
 0x1f6   :  { %608 = vmatmul.f32.vlgmr.msra.gmra.mxu1 %v2150_v25  ;;  %628 = vmatmul.f32.vlgmr.msra.gmra.mxu2 %v2150_v25 }
 0x1f7   :  { %648 = vmatmul.f32.vlgmr.msra.gmra.mxu3 %v2150_v25  ;;  %856 = vmatpush.msra.mxu1 %v1668_v20  ;;  %v2631_v20 = vld [vmem:[#allocation10_spill] sm:$0xff] }
 0x1f8   :  { %928 = vmatpush.msra.mxu2 %v1683_v26  ;;  %948 = vmatpush.msra.mxu3 %v1708_v32  ;;  %v2634_v26 = vld [vmem:[#allocation11_spill] sm:$0xff]  ;;  %v2639_v32 = vld [vmem:[#allocation26_spill] sm:$0xff] }
 0x1f9   :  { %857 = vmatpush.msra.mxu1 %v1672_v22  ;;  %v2632_v22 = vld [vmem:[#allocation16_spill] sm:$0xff] }
 0x1fa   :  { %929 = vmatpush.msra.mxu2 %v1695_v29  ;;  %949 = vmatpush.msra.mxu3 %v1719_v36  ;;  %v2636_v29 = vld [vmem:[#allocation15_spill] sm:$0xff] }
 0x1fb   :  { %858 = vmatpush.msra.mxu1 %v1675_v24  ;;  %v2633_v24 = vld [vmem:[#allocation14_spill] sm:$0xff] }
 0x1fc   :  { %930 = vmatpush.msra.mxu2 %v1701_v30  ;;  %950 = vmatpush.msra.mxu3 %v1733_v40  ;;  %v2637_v30 = vld [vmem:[#allocation12_spill] sm:$0xff]  ;;  %v2642_v40 = vld [vmem:[#allocation13_spill] sm:$0xff] }
 0x1fd   :  { %859 = vmatpush.msra.mxu1 %v1685_v27  ;;  %v2635_v27 = vld [vmem:[#allocation17_spill] sm:$0xff] }
 0x1fe   :  { %931 = vmatpush.msra.mxu2 %v1713_v34  ;;  %951 = vmatpush.msra.mxu3 %v1750_v45 }
 0x1ff   :  { %860 = vmatpush.msra.mxu1 %v1705_v31  ;;  %v2638_v31 = vld [vmem:[#allocation18_spill] sm:$0xff] }
 0x200   :  { %932 = vmatpush.msra.mxu2 %v1722_v37  ;;  %952 = vmatpush.msra.mxu3 %v1777_v54 }
 0x201   :  { %861 = vmatpush.msra.mxu1 %v1711_v33  ;;  %v2640_v33 = vld [vmem:[#allocation20_spill] sm:$0xff] }
 0x202   :  { %933 = vmatpush.msra.mxu2 %v1736_v41  ;;  %953 = vmatpush.msra.mxu3 %v1790_v57  ;;  %v190_v34 = vadd.f32 %v2640_v33, %v2639_v32 }
 0x203   :  { %862 = vmatpush.msra.mxu1 %v1715_v35 }
 0x204   :  { %934 = vmatpush.msra.mxu2 %v1743_v42  ;;  %954 = vmatpush.msra.mxu3 %v1796_v59 }
 0x205   :  { %863 = vmatpush.msra.mxu1 %v1724_v38  ;;  %v2641_v38 = vld [vmem:[#allocation28_spill] sm:$0xff] }
 0x206   :  { %935 = vmatpush.msra.mxu2 %v1754_v48  ;;  %955 = vmatpush.msra.mxu3 %v1835_v2  ;;  %v231_v41 = vadd.f32 %v2642_v40, %v2641_v38  ;;  %v2228_v40 = vld [vmem:[#allocation6 + $0x150] sm:$0xff] }
 0x207   :  { %864 = vmatpush.msra.mxu1 %v1747_v44 }
 0x208   :  { %936 = vmatpush.msra.mxu2 %v1766_v52  ;;  %956 = vmatpush.msra.mxu3 %v1846_v6 }
 0x209   :  { %865 = vmatpush.msra.mxu1 %v1752_v47 }
 0x20a   :  { %937 = vmatpush.msra.mxu2 %v1779_v55  ;;  %957 = vmatpush.msra.mxu3 %v1853_v9 }
 0x20b   :  { %866 = vmatpush.msra.mxu1 %v1764_v51 }
 0x20c   :  { %938 = vmatpush.msra.mxu2 %v1786_v56  ;;  %958 = vmatpush.msra.mxu3 %v1859_v12 }
 0x20d   :  { %867 = vmatpush.msra.mxu1 %v1837_v3 }
 0x20e   :  { %939 = vmatpush.msra.mxu2 %v1794_v58  ;;  %959 = vmatpush.msra.mxu3 %v1866_v15 }
 0x20f   :  { %868 = vmatpush.msra.mxu1 %v1848_v7 }
 0x210   :  { %940 = vmatpush.msra.mxu2 %v1805_v61  ;;  %960 = vmatpush.msra.mxu3 %v1876_v17 }
 0x211   :  { %869 = vmatpush.msra.mxu1 %v2608_v62 }
 0x212   :  { %941 = vmatpush.msra.mxu2 %v2631_v20  ;;  %961 = vmatpush.msra.mxu3 %v2632_v22 }
 0x213   :  { %870 = vmatpush.msra.mxu1 %v2633_v24 }
 0x214   :  { %942 = vmatpush.msra.mxu2 %v2634_v26  ;;  %962 = vmatpush.msra.mxu3 %v2635_v27 }
 0x215   :  { %871 = vmatpush.msra.mxu1 %v2636_v29 }
 0x216   :  { %943 = vmatpush.msra.mxu2 %v2637_v30  ;;  %963 = vmatpush.msra.mxu3 %v2638_v31 }
 0x273   :  { %v609_v35 = vpop.f32.mrf.mxu1 }
 0x274   :  { %v652_v36 = vadd.f32 %v609_v35, %v190_v34  ;;  %v2216_v34 = vld [vmem:[#allocation6 + $0x178] sm:$0xff]  ;;  %v2219_v35 = vld [vmem:[#allocation6 + $0x168] sm:$0xff] }
 0x276   :  { %v1373_v37 = vmul.f32 -1.442695, %v652_v36  ;;  %v2222_v36 = vld [vmem:[#allocation6 + $0x170] sm:$0xff] }
 0x278   :  { %1422 = vpow2.f32 %v1373_v37  ;;  %v2225_v37 = vld [vmem:[#allocation6 + $0x160] sm:$0xff] }
 0x279   :  { %v629_v42 = vpop.f32.mrf.mxu2 }
 0x27a   :  { %v672_v44 = vadd.f32 %v629_v42, %v231_v41  ;;  %v649_v63 = vpop.f32.mrf.mxu3  ;;  %v2231_v41 = vld [vmem:[#allocation6 + $0x158] sm:$0xff]  ;;  %v2234_v42 = vld [vmem:[#allocation6 + $0x148] sm:$0xff] }
 0x27b   :  { %v692_v16 = vadd.f32 %v2063_v60, %v649_v63  ;;  %v2276_v63 = vld [vmem:[#allocation6 + $0xe0] sm:$0xff] }
 0x27c   :  { %v1374_v45 = vmul.f32 -1.442695, %v672_v44  ;;  %v2237_v44 = vld [vmem:[#allocation6 + $0x138] sm:$0xff] }
 0x27e   :  { %v1423_v47 = vpop.eup %1422  ;;  %1424 = vpow2.f32 %v1374_v45  ;;  %v2240_v45 = vld [vmem:[#allocation6 + $0x140] sm:$0xff] }
 0x27f   :  { %v656_v48 = vadd.f32 1.0, %v1423_v47  ;;  %v2243_v47 = vld [vmem:[#allocation6 + $0x130] sm:$0xff] }
 0x281   :  { %1426 = vrcp.f32 %v656_v48  ;;  %v668_v57 = vand.u32 2147483648, %v656_v48  ;;  %v666_v59 = vand.u32 2147483647, %v656_v48  ;;  %vm662_vm3 = vweird.f32 %v656_v48 }
 0x283   :  { %v669_v43 = vor.u32 1.1754944e-38, %v668_v57  ;;  %vm667_vm5 = vcmp.eq.f32.partialorder %v666_v59, 8.507059e+37  ;;  %v2264_v57 = vld [vmem:[#allocation6 + $0xf0] sm:$0xff]  ;;  %v2270_v59 = vld [vmem:[#allocation6 + $0xe8] sm:$0xff] }
 0x284   :  { %v1425_v51 = vpop.eup %1424 }
 0x285   :  { %v676_v52 = vadd.f32 1.0, %v1425_v51  ;;  %v2249_v51 = vld [vmem:[#allocation6 + $0x128] sm:$0xff] }
 0x287   :  { %v1427_v54 = vpop.eup %1426  ;;  %1428 = vrcp.f32 %v676_v52  ;;  %v688_v5 = vand.u32 2147483648, %v676_v52  ;;  %v686_v10 = vand.u32 2147483647, %v676_v52  ;;  %vm682_vm7 = vweird.f32 %v676_v52 }
 0x288   :  { %v658_v55 = vmul.f32 %v1427_v54, %v656_v48  ;;  %vm663_vm2 = vweird.f32 %v1427_v54  ;;  %v2246_v48 = vld [vmem:[#allocation6 + $0x120] sm:$0xff] }
 0x289   :  { %vm664_vm4 = vmor %vm662_vm3, %vm663_vm2  ;;  %v689_v28 = vor.u32 1.1754944e-38, %v688_v5  ;;  %vm687_vm9 = vcmp.eq.f32.partialorder %v686_v10, 8.507059e+37 }
 0x28a   :  { %v659_v56 = vsub.f32 1.0, %v658_v55  ;;  %v2258_v55 = vld [vmem:[#allocation6 + $0x110] sm:$0xff] }
 0x28c   :  { %v660_v58 = vmul.f32 %v1427_v54, %v659_v56  ;;  %v2261_v56 = vld [vmem:[#allocation6 + $0x100] sm:$0xff] }
 0x28d   :  { %v1429_v61 = vpop.eup %1428 }
 0x28e   :  { %v678_v19 = vmul.f32 %v1429_v61, %v676_v52  ;;  %v661_v46 = vadd.f32 %v1427_v54, %v660_v58  ;;  %vm683_vm6 = vweird.f32 %v1429_v61  ;;  %v2252_v52 = vld [vmem:[#allocation6 + $0x118] sm:$0xff] }
 0x28f   :  { %vm684_vm8 = vmor %vm682_vm7, %vm683_vm6  ;;  %v2267_v58 = vld [vmem:[#allocation6 + $0xf8] sm:$0xff] }
 0x290   :  { %v679_v39 = vsub.f32 1.0, %v678_v19  ;;  %v665_v8 = vsel %vm664_vm4, %v1427_v54, %v661_v46  ;;  %v2255_v54 = vld [vmem:[#allocation6 + $0x108] sm:$0xff]  ;;  %v2279_v19 = vld [vmem:[#allocation6 + $0xd0] sm:$0xff]  ;;  %v2282_v46 = vld [vmem:[#allocation6 + $0xc0] sm:$0xff] }
 0x291   :  { %v670_v23 = vsel %vm667_vm5, %v669_v43, %v665_v8  ;;  %v2286_v43 = vld [vmem:[#allocation6 + $0xb8] sm:$0xff]  ;;  %v2293_v8 = vld [vmem:[#allocation6 + $0xa0] sm:$0xff] }
 0x292   :  { %v680_v49 = vmul.f32 %v1429_v61, %v679_v39  ;;  %v693_v11 = vmul.f32 %v692_v16, %v670_v23  ;;  %v2289_v39 = vld [vmem:[#allocation6 + $0xa8] sm:$0xff]  ;;  %v2296_v16 = vld [vmem:[#allocation6 + $0x90] sm:$0xff] }
 0x294   :  { %v681_v53 = vadd.f32 %v1429_v61, %v680_v49  ;;  %v694_v4 = vadd.f32 %v693_v11, %v272_v13  ;;  %v2318_v13 = vld [vmem:[#allocation6 + $0x30] sm:$0xff] }
 0x296   :  { %v685_v18 = vsel %vm684_vm8, %v1429_v61, %v681_v53  ;;  %1430 = vtanh.f32 %v694_v4  ;;  %v2273_v61 = vld [vmem:[#allocation6 + $0xd8] sm:$0xff] }
 0x297   :  { %v690_v14 = vsel %vm687_vm9, %v689_v28, %v685_v18 }
 0x298   :  { %v696_v50 = vsub.f32 1.0, %v690_v14  ;;  %v698_v30 = vmul.f32 %v690_v14, %v2150_v25 }
 0x29c   :  { %v1431_v20 = vpop.eup %1430 }
 0x29d   :  { %v697_v26 = vmul.f32 %v1431_v20, %v696_v50 }
 0x29f   :  { %v2211_v33 = vadd.f32 %v698_v30, %v697_v26 }
 0x2a1   :  { %720 = vmatmul.f32.vlgmr.msrb.gmra.mxu0 %v2211_v33  ;;  %740 = vmatmul.f32.vlgmr.msrb.gmra.mxu1 %v2211_v33 }
 0x2a2   :  { %760 = vmatmul.f32.vlgmr.msrb.gmra.mxu2 %v2211_v33  ;;  %968 = vmatpush.msrb.mxu0 %v2216_v34 }
 0x2a3   :  { %1040 = vmatpush.msrb.mxu1 %v2219_v35  ;;  %1060 = vmatpush.msrb.mxu2 %v2222_v36 }
 0x2a4   :  { %969 = vmatpush.msrb.mxu0 %v2225_v37 }
 0x2a5   :  { %1041 = vmatpush.msrb.mxu1 %v2228_v40  ;;  %1061 = vmatpush.msrb.mxu2 %v2231_v41 }
 0x2a6   :  { %970 = vmatpush.msrb.mxu0 %v2234_v42 }
 0x2a7   :  { %1042 = vmatpush.msrb.mxu1 %v2237_v44  ;;  %1062 = vmatpush.msrb.mxu2 %v2240_v45 }
 0x2a8   :  { %971 = vmatpush.msrb.mxu0 %v2243_v47 }
 0x2a9   :  { %1043 = vmatpush.msrb.mxu1 %v2246_v48  ;;  %1063 = vmatpush.msrb.mxu2 %v2249_v51 }
 0x2aa   :  { %972 = vmatpush.msrb.mxu0 %v2252_v52 }
 0x2ab   :  { %1044 = vmatpush.msrb.mxu1 %v2255_v54  ;;  %1064 = vmatpush.msrb.mxu2 %v2258_v55 }
 0x2ac   :  { %973 = vmatpush.msrb.mxu0 %v2261_v56 }
 0x2ad   :  { %1045 = vmatpush.msrb.mxu1 %v2264_v57  ;;  %1065 = vmatpush.msrb.mxu2 %v2267_v58 }
 0x2ae   :  { %974 = vmatpush.msrb.mxu0 %v2270_v59 }
 0x2af   :  { %1046 = vmatpush.msrb.mxu1 %v2273_v61  ;;  %1066 = vmatpush.msrb.mxu2 %v2276_v63 }
 0x2b0   :  { %975 = vmatpush.msrb.mxu0 %v2279_v19 }
 0x2b1   :  { %1047 = vmatpush.msrb.mxu1 %v2282_v46  ;;  %1067 = vmatpush.msrb.mxu2 %v1835_v2  ;;  %v2300_v2 = vld [vmem:[#allocation6 + $0x88] sm:$0xff] }
 0x2b2   :  { %976 = vmatpush.msrb.mxu0 %v2286_v43 }
 0x2b3   :  { %1048 = vmatpush.msrb.mxu1 %v2289_v39  ;;  %1068 = vmatpush.msrb.mxu2 %v1846_v6  ;;  %v2308_v6 = vld [vmem:[#allocation6 + $0x60] sm:$0xff] }
 0x2b4   :  { %977 = vmatpush.msrb.mxu0 %v2293_v8 }
 0x2b5   :  { %1049 = vmatpush.msrb.mxu1 %v2296_v16  ;;  %1069 = vmatpush.msrb.mxu2 %v1853_v9  ;;  %v2313_v9 = vld [vmem:[#allocation6 + $0x48] sm:$0xff] }
 0x2b6   :  { %978 = vmatpush.msrb.mxu0 %v2300_v2 }
 0x2b7   :  { %1050 = vmatpush.msrb.mxu1 %v2303_v1  ;;  %1070 = vmatpush.msrb.mxu2 %v1859_v12  ;;  %v2644_v12 = vld [vmem:[#allocation22_spill] sm:$0xff] }
 0x2b8   :  { %979 = vmatpush.msrb.mxu0 %v1837_v3  ;;  %v2323_v3 = vld [vmem:[#allocation6 + $0x18] sm:$0xff] }
 0x2b9   :  { %1051 = vmatpush.msrb.mxu1 %v2308_v6  ;;  %1071 = vmatpush.msrb.mxu2 %v1866_v15  ;;  %v193_v15 = vadd.f32 %v2644_v12, %v2639_v32 }
 0x2ba   :  { %980 = vmatpush.msrb.mxu0 %v1848_v7  ;;  %v2328_v7 = vld [vmem:[#allocation6] sm:$0xff] }
 0x2bb   :  { %1052 = vmatpush.msrb.mxu1 %v2313_v9  ;;  %1072 = vmatpush.msrb.mxu2 %v1876_v17  ;;  %v2645_v17 = vld [vmem:[#allocation31_spill] sm:$0xff] }
 0x2bc   :  { %981 = vmatpush.msrb.mxu0 %v2608_v62  ;;  %v234_v62 = vadd.f32 %v2645_v17, %v2641_v38 }
 0x2bd   :  { %1053 = vmatpush.msrb.mxu1 %v2318_v13  ;;  %1073 = vmatpush.msrb.mxu2 %v2632_v22 }
 0x2be   :  { %982 = vmatpush.msrb.mxu0 %v2633_v24 }
 0x2bf   :  { %1054 = vmatpush.msrb.mxu1 %v2323_v3  ;;  %1074 = vmatpush.msrb.mxu2 %v2635_v27 }
 0x2c0   :  { %983 = vmatpush.msrb.mxu0 %v2636_v29 }
 0x2c1   :  { %1055 = vmatpush.msrb.mxu1 %v2328_v7  ;;  %1075 = vmatpush.msrb.mxu2 %v2638_v31 }
 0x31e   :  { %v721_v22 = vpop.f32.mrf.mxu0  ;;  %v741_v24 = vpop.f32.mrf.mxu1 }
 0x31f   :  { %v764_v23 = vadd.f32 %v721_v22, %v193_v15  ;;  %v784_v49 = vadd.f32 %v741_v24, %v234_v62 }
 0x321   :  { %v1375_v5 = vmul.f32 -1.442695, %v764_v23  ;;  %v1376_v27 = vmul.f32 -1.442695, %v784_v49 }
 0x323   :  { %1432 = vpow2.f32 %v1375_v5  ;;  %v2646_v5 = vld [vmem:[#allocation25_spill] sm:$0xff] }
 0x324   :  { %1434 = vpow2.f32 %v1376_v27  ;;  %v275_v27 = vadd.f32 %v2646_v5, %v2065_v0 }
 0x325   :  { %v761_v15 = vpop.f32.mrf.mxu2 }
 0x326   :  { %v804_v24 = vadd.f32 %v2063_v60, %v761_v15 }
 0x329   :  { %v1433_v29 = vpop.eup %1432 }
 0x32a   :  { %v1435_v11 = vpop.eup %1434  ;;  %v768_v10 = vadd.f32 1.0, %v1433_v29 }
 0x32b   :  { %v788_v53 = vadd.f32 1.0, %v1435_v11 }
 0x32c   :  { %1436 = vrcp.f32 %v768_v10  ;;  %v780_v20 = vand.u32 2147483648, %v768_v10  ;;  %v778_v30 = vand.u32 2147483647, %v768_v10  ;;  %vm774_vm11 = vweird.f32 %v768_v10 }
 0x32d   :  { %1438 = vrcp.f32 %v788_v53  ;;  %v800_v29 = vand.u32 2147483648, %v788_v53  ;;  %vm794_vm15 = vweird.f32 %v788_v53 }
 0x32e   :  { %v781_v62 = vor.u32 1.1754944e-38, %v780_v20  ;;  %vm779_vm13 = vcmp.eq.f32.partialorder %v778_v30, 8.507059e+37 }
 0x332   :  { %v1437_v31 = vpop.eup %1436 }
 0x333   :  { %v1439_v4 = vpop.eup %1438  ;;  %v770_v28 = vmul.f32 %v1437_v31, %v768_v10  ;;  %vm775_vm10 = vweird.f32 %v1437_v31  ;;  %v801_v10 = vor.u32 1.1754944e-38, %v800_v29 }
 0x334   :  { %v790_v18 = vmul.f32 %v1439_v4, %v788_v53  ;;  %vm776_vm12 = vmor %vm774_vm11, %vm775_vm10  ;;  %vm795_vm14 = vweird.f32 %v1439_v4 }
 0x335   :  { %v771_v14 = vsub.f32 1.0, %v770_v28  ;;  %v798_v28 = vand.u32 2147483647, %v788_v53  ;;  %vm796_vm0 = vmor %vm794_vm15, %vm795_vm14 }
 0x336   :  { %v791_v50 = vsub.f32 1.0, %v790_v18 }
 0x337   :  { %v772_v26 = vmul.f32 %v1437_v31, %v771_v14  ;;  %vm799_vm1 = vcmp.eq.f32.partialorder %v798_v28, 8.507059e+37 }
 0x338   :  { %v792_v12 = vmul.f32 %v1439_v4, %v791_v50 }
 0x339   :  { %v773_v17 = vadd.f32 %v1437_v31, %v772_v26 }
 0x33a   :  { %v793_v23 = vadd.f32 %v1439_v4, %v792_v12 }
 0x33b   :  { %v777_v22 = vsel %vm776_vm12, %v1437_v31, %v773_v17 }
 0x33c   :  { %v782_v49 = vsel %vm779_vm13, %v781_v62, %v777_v22  ;;  %v797_v14 = vsel %vm796_vm0, %v1439_v4, %v793_v23 }
 0x33d   :  { %v805_v11 = vmul.f32 %v804_v24, %v782_v49  ;;  %v802_v31 = vsel %vm799_vm1, %v801_v10, %v797_v14 }
 0x33e   :  { %v808_v50 = vsub.f32 1.0, %v802_v31  ;;  %v810_v30 = vmul.f32 %v802_v31, %v2211_v33 }
 0x33f   :  { %v806_v18 = vadd.f32 %v805_v11, %v275_v27 }
 0x341   :  { %1440 = vtanh.f32 %v806_v18 }
 0x347   :  { %v1441_v20 = vpop.eup %1440 }
 0x348   :  { %v809_v26 = vmul.f32 %v1441_v20, %v808_v50 }
 0x34a   :  { %v2340_v12 = vadd.f32 %v810_v30, %v809_v26 }
 0x34c   :  { %832 = vmatmul.f32.vlgmr.msrb.gmra.mxu3 %v2340_v12  ;;  %852 = vmatmul.f32.vlgmr.msra.gmra.mxu0 %v2340_v12 }
 0x34d   :  { %872 = vmatmul.f32.vlgmr.msra.gmra.mxu1 %v2340_v12  ;;  %1080 = vmatpush.msrb.mxu3 %v2216_v34 }
 0x34e   :  { %1152 = vmatpush.msra.mxu0 %v2219_v35  ;;  %1172 = vmatpush.msra.mxu1 %v2222_v36  ;;  %v1516_v35 = vld [vmem:[#allocation6 + $0xc8] sm:$0xff]  ;;  %v1517_v36 = vld [vmem:[#allocation6 + $0xb0] sm:$0xff] }
 0x34f   :  { %1081 = vmatpush.msrb.mxu3 %v2225_v37 }
 0x350   :  { %1153 = vmatpush.msra.mxu0 %v2228_v40  ;;  %1173 = vmatpush.msra.mxu1 %v2231_v41  ;;  %v1518_v40 = vld [vmem:[#allocation6 + $0x98] sm:$0xff]  ;;  %v1519_v41 = vld [vmem:[#allocation6 + $0x80] sm:$0xff] }
 0x351   :  { %1082 = vmatpush.msrb.mxu3 %v2234_v42 }
 0x352   :  { %1154 = vmatpush.msra.mxu0 %v2237_v44  ;;  %1174 = vmatpush.msra.mxu1 %v2240_v45  ;;  %v2374_v44 = vld [vmem:[#allocation6 + $0x70] sm:$0xff]  ;;  %v1521_v45 = vld [vmem:[#allocation6 + $0x68] sm:$0xff] }
 0x353   :  { %1083 = vmatpush.msrb.mxu3 %v2243_v47 }
 0x354   :  { %1155 = vmatpush.msra.mxu0 %v2246_v48  ;;  %1175 = vmatpush.msra.mxu1 %v2249_v51  ;;  %v2378_v48 = vld [vmem:[#allocation6 + $0x58] sm:$0xff]  ;;  %v1523_v51 = vld [vmem:[#allocation6 + $0x50] sm:$0xff] }
 0x355   :  { %1084 = vmatpush.msrb.mxu3 %v2252_v52 }
 0x356   :  { %1156 = vmatpush.msra.mxu0 %v2255_v54  ;;  %1176 = vmatpush.msra.mxu1 %v2258_v55  ;;  %v2382_v54 = vld [vmem:[#allocation6 + $0x40] sm:$0xff]  ;;  %v1525_v55 = vld [vmem:[#allocation6 + $0x38] sm:$0xff] }
 0x357   :  { %1085 = vmatpush.msrb.mxu3 %v2261_v56 }
 0x358   :  { %1157 = vmatpush.msra.mxu0 %v2264_v57  ;;  %1177 = vmatpush.msra.mxu1 %v2267_v58  ;;  %v2386_v57 = vld [vmem:[#allocation6 + $0x28] sm:$0xff]  ;;  %v1527_v58 = vld [vmem:[#allocation6 + $0x20] sm:$0xff] }
 0x359   :  { %1086 = vmatpush.msrb.mxu3 %v2270_v59 }
 0x35a   :  { %1158 = vmatpush.msra.mxu0 %v2273_v61  ;;  %1178 = vmatpush.msra.mxu1 %v2276_v63  ;;  %v2390_v61 = vld [vmem:[#allocation6 + $0x10] sm:$0xff]  ;;  %v1529_v63 = vld [vmem:[#allocation6 + $0x8] sm:$0xff] }
 0x35b   :  { %1087 = vmatpush.msrb.mxu3 %v2279_v19 }
 0x35c   :  { %1159 = vmatpush.msra.mxu0 %v2282_v46  ;;  %1179 = vmatpush.msra.mxu1 %v1516_v35  ;;  %v2647_v46 = vld [vmem:[#allocation32_spill] sm:$0xff]  ;;  %v2649_v35 = vld [vmem:[#allocation33_spill] sm:$0xff] }
 0x35d   :  { %1088 = vmatpush.msrb.mxu3 %v2286_v43 }
 0x35e   :  { %1160 = vmatpush.msra.mxu0 %v2289_v39  ;;  %1180 = vmatpush.msra.mxu1 %v1517_v36  ;;  %v237_v39 = vadd.f32 %v2647_v46, %v2641_v38  ;;  %v278_v36 = vadd.f32 %v2649_v35, %v2065_v0  ;;  %v2478_v35 = vld [vmem:[%s2561_s7] ss:$0 sm:$0xff] }
 0x35f   :  { %1089 = vmatpush.msrb.mxu3 %v2293_v8 }
 0x360   :  { %1161 = vmatpush.msra.mxu0 %v2296_v16  ;;  %1181 = vmatpush.msra.mxu1 %v1518_v40 }
 0x361   :  { %1090 = vmatpush.msrb.mxu3 %v2300_v2 }
 0x362   :  { %1162 = vmatpush.msra.mxu0 %v2303_v1  ;;  %1182 = vmatpush.msra.mxu1 %v1519_v41 }
 0x363   :  { %1091 = vmatpush.msrb.mxu3 %v2374_v44 }
 0x364   :  { %1163 = vmatpush.msra.mxu0 %v2308_v6  ;;  %1183 = vmatpush.msra.mxu1 %v1521_v45 }
 0x365   :  { %1092 = vmatpush.msrb.mxu3 %v2378_v48 }
 0x366   :  { %1164 = vmatpush.msra.mxu0 %v2313_v9  ;;  %1184 = vmatpush.msra.mxu1 %v1523_v51  ;;  %v2648_v9 = vld [vmem:[#allocation24_spill] sm:$0xff] }
 0x367   :  { %1093 = vmatpush.msrb.mxu3 %v2382_v54 }
 0x368   :  { %1165 = vmatpush.msra.mxu0 %v2318_v13  ;;  %1185 = vmatpush.msra.mxu1 %v1525_v55  ;;  %v196_v13 = vadd.f32 %v2648_v9, %v2639_v32  ;;  %v1277_v9 = vld [vmem:[%s2562_s8 + $0x40] sm:$0xff] }
 0x369   :  { %1094 = vmatpush.msrb.mxu3 %v2386_v57 }
 0x36a   :  { %1166 = vmatpush.msra.mxu0 %v2323_v3  ;;  %1186 = vmatpush.msra.mxu1 %v1527_v58 }
 0x36b   :  { %1095 = vmatpush.msrb.mxu3 %v2390_v61 }
 0x36c   :  { %1167 = vmatpush.msra.mxu0 %v2328_v7  ;;  %1187 = vmatpush.msra.mxu1 %v1529_v63 }
 0x3c9   :  { %v853_v16 = vpop.f32.mrf.mxu0 }
 0x3ca   :  { %v896_v1 = vadd.f32 %v853_v16, %v237_v39  ;;  %v873_v14 = vpop.f32.mrf.mxu1 }
 0x3cb   :  { %v916_v50 = vadd.f32 %v2063_v60, %v873_v14 }
 0x3cc   :  { %v1378_v6 = vmul.f32 -1.442695, %v896_v1 }
 0x3ce   :  { %1442 = vpow2.f32 %v1378_v6 }
 0x3cf   :  { %v833_v3 = vpop.f32.mrf.mxu3 }
 0x3d0   :  { %v876_v53 = vadd.f32 %v833_v3, %v196_v13  ;;  %v1276_v13 = vld [vmem:[%s2562_s8 + $0x38] sm:$0xff]  ;;  %v1275_v3 = vld [vmem:[%s2562_s8 + $0x30] sm:$0xff] }
 0x3d2   :  { %v1377_v4 = vmul.f32 -1.442695, %v876_v53  ;;  %v1274_v53 = vld [vmem:[%s2562_s8 + $0x28] sm:$0xff] }
 0x3d4   :  { %v1443_v15 = vpop.eup %1442  ;;  %1444 = vpow2.f32 %v1377_v4 }
 0x3d5   :  { %v900_v17 = vadd.f32 1.0, %v1443_v15  ;;  %v1273_v15 = vld [vmem:[%s2562_s8 + $0x20] sm:$0xff] }
 0x3d7   :  { %1446 = vrcp.f32 %v900_v17  ;;  %v912_v40 = vand.u32 2147483648, %v900_v17  ;;  %vm906_vm7 = vweird.f32 %v900_v17  ;;  %v910_v45 = vand.u32 2147483647, %v900_v17 }
 0x3d9   :  { %v913_v58 = vor.u32 1.1754944e-38, %v912_v40  ;;  %vm911_vm9 = vcmp.eq.f32.partialorder %v910_v45, 8.507059e+37 }
 0x3da   :  { %v1445_v7 = vpop.eup %1444 }
 0x3db   :  { %v880_v62 = vadd.f32 1.0, %v1445_v7 }
 0x3dd   :  { %1448 = vrcp.f32 %v880_v62  ;;  %v1447_v22 = vpop.eup %1446  ;;  %v892_v29 = vand.u32 2147483648, %v880_v62  ;;  %v890_v28 = vand.u32 2147483647, %v880_v62  ;;  %vm886_vm3 = vweird.f32 %v880_v62 }
 0x3de   :  { %v902_v24 = vmul.f32 %v1447_v22, %v900_v17  ;;  %vm907_vm6 = vweird.f32 %v1447_v22 }
 0x3df   :  { %v893_v31 = vor.u32 1.1754944e-38, %v892_v29  ;;  %vm891_vm5 = vcmp.eq.f32.partialorder %v890_v28, 8.507059e+37  ;;  %vm908_vm8 = vmor %vm906_vm7, %vm907_vm6 }
 0x3e0   :  { %v903_v5 = vsub.f32 1.0, %v902_v24  ;;  %v1271_v24 = vld [vmem:[%s2562_s8 + $0x10] sm:$0xff] }
 0x3e2   :  { %v904_v18 = vmul.f32 %v1447_v22, %v903_v5 }
 0x3e3   :  { %v1449_v23 = vpop.eup %1448 }
 0x3e4   :  { %v882_v49 = vmul.f32 %v1449_v23, %v880_v62  ;;  %vm887_vm2 = vweird.f32 %v1449_v23  ;;  %v905_v26 = vadd.f32 %v1447_v22, %v904_v18 }
 0x3e5   :  { %vm888_vm4 = vmor %vm886_vm3, %vm887_vm2 }
 0x3e6   :  { %v883_v27 = vsub.f32 1.0, %v882_v49  ;;  %v909_v55 = vsel %vm908_vm8, %v1447_v22, %v905_v26  ;;  %v1272_v22 = vld [vmem:[%s2562_s8 + $0x18] sm:$0xff]  ;;  %v1269_v49 = vld [vmem:[%s2562_s8] sm:$0xff] }
 0x3e7   :  { %v914_v63 = vsel %vm911_vm9, %v913_v58, %v909_v55 }
 0x3e8   :  { %v884_v11 = vmul.f32 %v1449_v23, %v883_v27  ;;  %v920_v60 = vsub.f32 1.0, %v914_v63  ;;  %v922_v16 = vmul.f32 %v914_v63, %v2340_v12 }
 0x3ea   :  { %v885_v10 = vadd.f32 %v1449_v23, %v884_v11 }
 0x3ec   :  { %v889_v20 = vsel %vm888_vm4, %v1449_v23, %v885_v10  ;;  %v1270_v23 = vld [vmem:[%s2562_s8 + $0x8] sm:$0xff] }
 0x3ed   :  { %v894_v30 = vsel %vm891_vm5, %v893_v31, %v889_v20 }
 0x3ee   :  { %v917_v41 = vmul.f32 %v916_v50, %v894_v30 }
 0x3f0   :  { %v918_v51 = vadd.f32 %v917_v41, %v278_v36 }
 0x3f2   :  { %1450 = vtanh.f32 %v918_v51  ;;  %v2652_v51 = vld [vmem:[#allocation35_spill] sm:$0xff] }
 0x3f3   :  { %v281_v55 = vadd.f32 %v2652_v51, %v2065_v0 }
 0x3f8   :  { %v1451_v46 = vpop.eup %1450 }
 0x3f9   :  { %v921_v39 = vmul.f32 %v1451_v46, %v920_v60 }
 0x3fb   :  { %v2402_v1 = vadd.f32 %v922_v16, %v921_v39 }
 0x3fd   :  { %944 = vmatmul.f32.vlgmr.msra.gmra.mxu2 %v2402_v1  ;;  %964 = vmatmul.f32.vlgmr.msra.gmra.mxu3 %v2402_v1 }
 0x3fe   :  { %984 = vmatmul.f32.vlgmr.msrb.gmra.mxu0 %v2402_v1  ;;  %1192 = vmatpush.msra.mxu2 %v2216_v34  ;;  %v1284_v34 = vld [vmem:[%s2562_s8 + $0x78] sm:$0xff] }
 0x3ff   :  { %1289 = vmatpush.msra.mxu3 %v1284_v34 }
 0x400   :  { %1193 = vmatpush.msra.mxu2 %v2225_v37  ;;  %v1283_v37 = vld [vmem:[%s2562_s8 + $0x70] sm:$0xff] }
 0x401   :  { %1290 = vmatpush.msra.mxu3 %v1283_v37 }
 0x402   :  { %1194 = vmatpush.msra.mxu2 %v2234_v42  ;;  %v1282_v42 = vld [vmem:[%s2562_s8 + $0x68] sm:$0xff] }
 0x403   :  { %1291 = vmatpush.msra.mxu3 %v1282_v42 }
 0x404   :  { %1195 = vmatpush.msra.mxu2 %v2243_v47  ;;  %v1281_v47 = vld [vmem:[%s2562_s8 + $0x60] sm:$0xff] }
 0x405   :  { %1292 = vmatpush.msra.mxu3 %v1281_v47 }
 0x406   :  { %1196 = vmatpush.msra.mxu2 %v2252_v52  ;;  %v2650_v52 = vld [vmem:[#allocation27_spill] sm:$0xff] }
 0x408   :  { %1197 = vmatpush.msra.mxu2 %v2261_v56  ;;  %v199_v56 = vadd.f32 %v2650_v52, %v2639_v32 }
 0x40a   :  { %1198 = vmatpush.msra.mxu2 %v2270_v59  ;;  %v2651_v59 = vld [vmem:[#allocation34_spill] sm:$0xff] }
 0x40c   :  { %1199 = vmatpush.msra.mxu2 %v2279_v19  ;;  %v240_v19 = vadd.f32 %v2651_v59, %v2641_v38  ;;  %v2653_v59 = vld [vmem:[#allocation29_spill] sm:$0xff] }
 0x40e   :  { %1200 = vmatpush.msra.mxu2 %v2286_v43  ;;  %v1280_v43 = vld [vmem:[%s2562_s8 + $0x58] sm:$0xff] }
 0x40f   :  { %1293 = vmatpush.msra.mxu3 %v1280_v43 }
 0x410   :  { %1201 = vmatpush.msra.mxu2 %v2293_v8  ;;  %v1279_v8 = vld [vmem:[%s2562_s8 + $0x50] sm:$0xff] }
 0x411   :  { %1294 = vmatpush.msra.mxu3 %v1279_v8 }
 0x412   :  { %1202 = vmatpush.msra.mxu2 %v2300_v2 }
 0x414   :  { %1203 = vmatpush.msra.mxu2 %v2374_v44 }
 0x416   :  { %1204 = vmatpush.msra.mxu2 %v2378_v48 }
 0x418   :  { %1205 = vmatpush.msra.mxu2 %v2382_v54 }
 0x41a   :  { %1206 = vmatpush.msra.mxu2 %v2386_v57  ;;  %v1278_v57 = vld [vmem:[%s2562_s8 + $0x48] sm:$0xff] }
 0x41b   :  { %1295 = vmatpush.msra.mxu3 %v1278_v57 }
 0x41c   :  { %1207 = vmatpush.msra.mxu2 %v2390_v61 }
 0x41d   :  { %1296 = vmatpush.msra.mxu3 %v1277_v9 }
 0x41f   :  { %1297 = vmatpush.msra.mxu3 %v1276_v13 }
 0x421   :  { %1298 = vmatpush.msra.mxu3 %v1275_v3 }
 0x423   :  { %1299 = vmatpush.msra.mxu3 %v1274_v53 }
 0x425   :  { %1300 = vmatpush.msra.mxu3 %v1273_v15 }
 0x427   :  { %1301 = vmatpush.msra.mxu3 %v1272_v22 }
 0x429   :  { %1302 = vmatpush.msra.mxu3 %v1271_v24 }
 0x42b   :  { %1303 = vmatpush.msra.mxu3 %v1270_v23 }
 0x42d   :  { %1304 = vmatpush.msra.mxu3 %v1269_v49 }
 0x47b   :  { %v985_v50 = vpop.f32.mrf.mxu0 }
 0x47c   :  { %v1028_v36 = vadd.f32 %v2478_v35, %v985_v50 }
 0x480   :  { %v945_v2 = vpop.f32.mrf.mxu2  ;;  %v965_v44 = vpop.f32.mrf.mxu3 }
 0x481   :  { %v988_v48 = vadd.f32 %v945_v2, %v199_v56  ;;  %v1008_v54 = vadd.f32 %v965_v44, %v240_v19  ;;  %v202_v19 = vadd.f32 %v2653_v59, %v2639_v32  ;;  %v2654_v44 = vld [vmem:[#allocation36_spill] sm:$0xff]  ;;  %v2657_v59 = vld [vmem:[#allocation38_spill] sm:$0xff] }
 0x483   :  { %v1379_v61 = vmul.f32 -1.442695, %v988_v48  ;;  %v1380_v6 = vmul.f32 -1.442695, %v1008_v54  ;;  %v243_v48 = vadd.f32 %v2654_v44, %v2641_v38 }
 0x485   :  { %1452 = vpow2.f32 %v1379_v61 }
 0x486   :  { %1454 = vpow2.f32 %v1380_v6 }
 0x48b   :  { %v1453_v4 = vpop.eup %1452 }
 0x48c   :  { %v1455_v17 = vpop.eup %1454  ;;  %v992_v7 = vadd.f32 1.0, %v1453_v4 }
 0x48d   :  { %v1012_v62 = vadd.f32 1.0, %v1455_v17 }
 0x48e   :  { %1456 = vrcp.f32 %v992_v7  ;;  %v1004_v18 = vand.u32 2147483648, %v992_v7  ;;  %v1002_v31 = vand.u32 2147483647, %v992_v7  ;;  %vm998_vm11 = vweird.f32 %v992_v7 }
 0x48f   :  { %1458 = vrcp.f32 %v1012_v62  ;;  %v1024_v63 = vand.u32 2147483648, %v1012_v62  ;;  %vm1018_vm15 = vweird.f32 %v1012_v62  ;;  %v1022_v60 = vand.u32 2147483647, %v1012_v62 }
 0x490   :  { %v1005_v30 = vor.u32 1.1754944e-38, %v1004_v18  ;;  %vm1003_vm13 = vcmp.eq.f32.partialorder %v1002_v31, 8.507059e+37 }
 0x491   :  { %v1025_v16 = vor.u32 1.1754944e-38, %v1024_v63  ;;  %vm1023_vm1 = vcmp.eq.f32.partialorder %v1022_v60, 8.507059e+37 }
 0x494   :  { %v1457_v5 = vpop.eup %1456 }
 0x495   :  { %v1459_v27 = vpop.eup %1458  ;;  %v994_v29 = vmul.f32 %v1457_v5, %v992_v7  ;;  %vm999_vm10 = vweird.f32 %v1457_v5 }
 0x496   :  { %v1014_v11 = vmul.f32 %v1459_v27, %v1012_v62  ;;  %vm1000_vm12 = vmor %vm998_vm11, %vm999_vm10  ;;  %vm1019_vm14 = vweird.f32 %v1459_v27 }
 0x497   :  { %v995_v28 = vsub.f32 1.0, %v994_v29  ;;  %vm1020_vm0 = vmor %vm1018_vm15, %vm1019_vm14 }
 0x498   :  { %v1015_v14 = vsub.f32 1.0, %v1014_v11 }
 0x499   :  { %v996_v10 = vmul.f32 %v1457_v5, %v995_v28  ;;  %v2655_v28 = vld [vmem:[#allocation37_spill] sm:$0xff] }
 0x49a   :  { %v1016_v20 = vmul.f32 %v1459_v27, %v1015_v14  ;;  %v284_v18 = vadd.f32 %v2655_v28, %v2065_v0 }
 0x49b   :  { %v997_v26 = vadd.f32 %v1457_v5, %v996_v10 }
 0x49c   :  { %v1017_v45 = vadd.f32 %v1459_v27, %v1016_v20 }
 0x49d   :  { %v1001_v40 = vsel %vm1000_vm12, %v1457_v5, %v997_v26 }
 0x49e   :  { %v1006_v41 = vsel %vm1003_vm13, %v1005_v30, %v1001_v40  ;;  %v1021_v39 = vsel %vm1020_vm0, %v1459_v27, %v1017_v45 }
 0x49f   :  { %v1029_v58 = vmul.f32 %v1028_v36, %v1006_v41  ;;  %v1026_v34 = vsel %vm1023_vm1, %v1025_v16, %v1021_v39 }
 0x4a0   :  { %v1032_v37 = vsub.f32 1.0, %v1026_v34  ;;  %v1034_v52 = vmul.f32 %v1026_v34, %v2402_v1 }
 0x4a1   :  { %v1030_v46 = vadd.f32 %v1029_v58, %v281_v55 }
 0x4a3   :  { %1460 = vtanh.f32 %v1030_v46 }
 0x4a9   :  { %v1461_v42 = vpop.eup %1460 }
 0x4aa   :  { %v1033_v47 = vmul.f32 %v1461_v42, %v1032_v37 }
 0x4ac   :  { %v2484_v56 = vadd.f32 %v1034_v52, %v1033_v47  ;;  %v2656_v52 = vld [vmem:[#allocation30_spill] sm:$0xff] }
 0x4ae   :  { %1056 = vmatmul.f32.vlgmr.msrb.gmra.mxu1 %v2484_v56  ;;  %1076 = vmatmul.f32.vlgmr.msrb.gmra.mxu2 %v2484_v56 }
 0x4af   :  { %1096 = vmatmul.f32.vlgmr.msrb.gmra.mxu3 %v2484_v56 }
 0x4b7   :  { %1305 = vmatmul.f32.vlgmr.msra.gmra.mxu3 %v2070_v21 }
 0x4bf   :  { %1308 = vmatmul.f32.gmra.mxu3 %v2150_v25 }
 0x4c7   :  { %1311 = vmatmul.f32.gmra.mxu3 %v2211_v33 }
 0x4cf   :  { %1314 = vmatmul.f32.gmra.mxu3 %v2340_v12 }
 0x4d7   :  { %1317 = vmatmul.f32.gmra.mxu3 %v2402_v1  ;;  %v2502_v1 = vld [vmem:[%s2563_s9] ss:$0 sm:$0xff] }
 0x4df   :  { %1320 = vmatmul.f32.gmra.mxu3 %v2484_v56 }
 0x52b   :  { %v1057_v43 = vpop.f32.mrf.mxu1 }
 0x52c   :  { %v1100_v8 = vadd.f32 %v1057_v43, %v202_v19  ;;  %v246_v19 = vadd.f32 %v2657_v59, %v2641_v38 }
 0x52e   :  { %v1381_v2 = vmul.f32 -1.442695, %v1100_v8 }
 0x530   :  { %1462 = vpow2.f32 %v1381_v2 }
 0x531   :  { %v1077_v21 = vpop.f32.mrf.mxu2 }
 0x532   :  { %v1120_v25 = vadd.f32 %v1077_v21, %v243_v48  ;;  %v1097_v54 = vpop.f32.mrf.mxu3 }
 0x533   :  { %v1140_v11 = vadd.f32 %v2478_v35, %v1097_v54 }
 0x534   :  { %v1382_v33 = vmul.f32 -1.442695, %v1120_v25 }
 0x536   :  { %v1463_v57 = vpop.eup %1462  ;;  %1464 = vpow2.f32 %v1382_v33 }
 0x537   :  { %v1104_v12 = vadd.f32 1.0, %v1463_v57 }
 0x539   :  { %1466 = vrcp.f32 %v1104_v12  ;;  %v1116_v17 = vand.u32 2147483648, %v1104_v12  ;;  %v1114_v22 = vand.u32 2147483647, %v1104_v12  ;;  %vm1110_vm3 = vweird.f32 %v1104_v12 }
 0x53a   :  { %v1306_v61 = vpop.f32.mrf.mxu3 }
 0x53b   :  { %v1307_v6 = vadd.f32 %v2502_v1, %v1306_v61  ;;  %v1117_v5 = vor.u32 1.1754944e-38, %v1116_v17  ;;  %vm1115_vm5 = vcmp.eq.f32.partialorder %v1114_v22, 8.507059e+37 }
 0x53c   :  { %v1465_v9 = vpop.eup %1464 }
 0x53d   :  { %v1124_v13 = vadd.f32 1.0, %v1465_v9  ;;  %1330 = vst [vmem:[%s2564_s10] sm:$0xff] %v1307_v6 }
 0x53f   :  { %v1467_v3 = vpop.eup %1466  ;;  %1468 = vrcp.f32 %v1124_v13  ;;  %v1136_v31 = vand.u32 2147483648, %v1124_v13  ;;  %v1134_v26 = vand.u32 2147483647, %v1124_v13  ;;  %vm1130_vm7 = vweird.f32 %v1124_v13 }
 0x540   :  { %v1106_v53 = vmul.f32 %v1467_v3, %v1104_v12  ;;  %vm1111_vm2 = vweird.f32 %v1467_v3 }
 0x541   :  { %vm1112_vm4 = vmor %vm1110_vm3, %vm1111_vm2  ;;  %v1137_v41 = vor.u32 1.1754944e-38, %v1136_v31  ;;  %vm1135_vm9 = vcmp.eq.f32.partialorder %v1134_v26, 8.507059e+37 }
 0x542   :  { %v1107_v4 = vsub.f32 1.0, %v1106_v53  ;;  %v1309_v15 = vpop.f32.mrf.mxu3 }
 0x543   :  { %v1310_v7 = vadd.f32 %v2502_v1, %v1309_v15 }
 0x544   :  { %v1108_v62 = vmul.f32 %v1467_v3, %v1107_v4 }
 0x545   :  { %v1469_v24 = vpop.eup %1468  ;;  %1331 = vst [vmem:[%s2564_s10 + $0x8] sm:$0xff] %v1310_v7 }
 0x546   :  { %v1126_v23 = vmul.f32 %v1469_v24, %v1124_v13  ;;  %v1109_v49 = vadd.f32 %v1467_v3, %v1108_v62  ;;  %vm1131_vm6 = vweird.f32 %v1469_v24 }
 0x547   :  { %vm1132_vm8 = vmor %vm1130_vm7, %vm1131_vm6 }
 0x548   :  { %v1127_v27 = vsub.f32 1.0, %v1126_v23  ;;  %v1113_v29 = vsel %vm1112_vm4, %v1467_v3, %v1109_v49 }
 0x549   :  { %v1118_v14 = vsel %vm1115_vm5, %v1117_v5, %v1113_v29 }
 0x54a   :  { %v1128_v10 = vmul.f32 %v1469_v24, %v1127_v27  ;;  %v1141_v50 = vmul.f32 %v1140_v11, %v1118_v14  ;;  %v1312_v20 = vpop.f32.mrf.mxu3  ;;  %v2658_v27 = vld [vmem:[#allocation39_spill] sm:$0xff] }
 0x54b   :  { %v1313_v30 = vadd.f32 %v2502_v1, %v1312_v20  ;;  %v287_v29 = vadd.f32 %v2658_v27, %v2065_v0 }
 0x54c   :  { %v1129_v36 = vadd.f32 %v1469_v24, %v1128_v10  ;;  %v1142_v40 = vadd.f32 %v1141_v50, %v284_v18 }
 0x54d   :  { %1332 = vst [vmem:[%s2564_s10 + $0x10] sm:$0xff] %v1313_v30 }
 0x54e   :  { %v1133_v45 = vsel %vm1132_vm8, %v1469_v24, %v1129_v36  ;;  %1470 = vtanh.f32 %v1142_v40 }
 0x54f   :  { %v1138_v51 = vsel %vm1135_vm9, %v1137_v41, %v1133_v45 }
 0x550   :  { %v1144_v58 = vsub.f32 1.0, %v1138_v51  ;;  %v1146_v39 = vmul.f32 %v1138_v51, %v2484_v56  ;;  %v205_v56 = vadd.f32 %v2656_v52, %v2639_v32 }
 0x552   :  { %v1315_v55 = vpop.f32.mrf.mxu3 }
 0x553   :  { %v1316_v63 = vadd.f32 %v2502_v1, %v1315_v55 }
 0x554   :  { %v1471_v60 = vpop.eup %1470 }
 0x555   :  { %v1145_v46 = vmul.f32 %v1471_v60, %v1144_v58  ;;  %1333 = vst [vmem:[%s2564_s10 + $0x18] sm:$0xff] %v1316_v63 }
 0x557   :  { %v2524_v16 = vadd.f32 %v1146_v39, %v1145_v46 }
 0x559   :  { %1168 = vmatmul.f32.vlgmr.msra.gmra.mxu0 %v2524_v16  ;;  %1188 = vmatmul.f32.vlgmr.msra.gmra.mxu1 %v2524_v16 }
 0x55a   :  { %1208 = vmatmul.f32.vlgmr.msra.gmra.mxu2 %v2524_v16  ;;  %v1318_v34 = vpop.f32.mrf.mxu3  ;;  %1323 = vmatmul.f32.gmra.mxu3 %v2524_v16 }
 0x55b   :  { %v1319_v37 = vadd.f32 %v2502_v1, %v1318_v34 }
 0x55d   :  { %1334 = vst [vmem:[%s2564_s10 + $0x20] sm:$0xff] %v1319_v37 }
 0x562   :  { %v1321_v42 = vpop.f32.mrf.mxu3 }
 0x563   :  { %v1322_v47 = vadd.f32 %v2502_v1, %v1321_v42 }
 0x565   :  { %1335 = vst [vmem:[%s2564_s10 + $0x28] sm:$0xff] %v1322_v47 }
 0x5d6   :  { %v1169_v43 = vpop.f32.mrf.mxu0  ;;  %v1189_v8 = vpop.f32.mrf.mxu1 }
 0x5d7   :  { %v1212_v2 = vadd.f32 %v1169_v43, %v205_v56  ;;  %v1232_v44 = vadd.f32 %v1189_v8, %v246_v19 }
 0x5d9   :  { %v1383_v48 = vmul.f32 -1.442695, %v1212_v2  ;;  %v1384_v21 = vmul.f32 -1.442695, %v1232_v44 }
 0x5db   :  { %1472 = vpow2.f32 %v1383_v48 }
 0x5dc   :  { %1474 = vpow2.f32 %v1384_v21 }
 0x5dd   :  { %v1324_v25 = vpop.f32.mrf.mxu3  ;;  %v1209_v17 = vpop.f32.mrf.mxu2 }
 0x5de   :  { %v1325_v54 = vadd.f32 %v2502_v1, %v1324_v25  ;;  %v1252_v23 = vadd.f32 %v2478_v35, %v1209_v17 }
 0x5e0   :  { %1336 = vst [vmem:[%s2564_s10 + $0x30] sm:$0xff] %v1325_v54 }
 0x5e1   :  { %v1473_v33 = vpop.eup %1472 }
 0x5e2   :  { %v1475_v32 = vpop.eup %1474  ;;  %v1216_v57 = vadd.f32 1.0, %v1473_v33 }
 0x5e3   :  { %v1236_v12 = vadd.f32 1.0, %v1475_v32 }
 0x5e4   :  { %1476 = vrcp.f32 %v1216_v57  ;;  %v1228_v3 = vand.u32 2147483648, %v1216_v57  ;;  %v1226_v15 = vand.u32 2147483647, %v1216_v57  ;;  %vm1222_vm11 = vweird.f32 %v1216_v57 }
 0x5e5   :  { %1478 = vrcp.f32 %v1236_v12  ;;  %v1248_v28 = vand.u32 2147483648, %v1236_v12  ;;  %vm1242_vm15 = vweird.f32 %v1236_v12  ;;  %v1246_v18 = vand.u32 2147483647, %v1236_v12 }
 0x5e6   :  { %v1229_v22 = vor.u32 1.1754944e-38, %v1228_v3  ;;  %vm1227_vm13 = vcmp.eq.f32.partialorder %v1226_v15, 8.507059e+37 }
 0x5e7   :  { %v1249_v31 = vor.u32 1.1754944e-38, %v1248_v28  ;;  %vm1247_vm1 = vcmp.eq.f32.partialorder %v1246_v18, 8.507059e+37 }
 0x5ea   :  { %v1477_v38 = vpop.eup %1476 }
 0x5eb   :  { %v1479_v61 = vpop.eup %1478  ;;  %v1218_v6 = vmul.f32 %v1477_v38, %v1216_v57  ;;  %vm1223_vm10 = vweird.f32 %v1477_v38 }
 0x5ec   :  { %v1238_v9 = vmul.f32 %v1479_v61, %v1236_v12  ;;  %vm1224_vm12 = vmor %vm1222_vm11, %vm1223_vm10  ;;  %vm1243_vm14 = vweird.f32 %v1479_v61 }
 0x5ed   :  { %v1219_v13 = vsub.f32 1.0, %v1218_v6  ;;  %vm1244_vm0 = vmor %vm1242_vm15, %vm1243_vm14 }
 0x5ee   :  { %v1239_v53 = vsub.f32 1.0, %v1238_v9 }
 0x5ef   :  { %v1220_v4 = vmul.f32 %v1477_v38, %v1219_v13 }
 0x5f0   :  { %v1240_v7 = vmul.f32 %v1479_v61, %v1239_v53 }
 0x5f1   :  { %v1221_v62 = vadd.f32 %v1477_v38, %v1220_v4 }
 0x5f2   :  { %v1241_v5 = vadd.f32 %v1479_v61, %v1240_v7 }
 0x5f3   :  { %v1225_v24 = vsel %vm1224_vm12, %v1477_v38, %v1221_v62 }
 0x5f4   :  { %v1230_v49 = vsel %vm1227_vm13, %v1229_v22, %v1225_v24  ;;  %v1245_v10 = vsel %vm1244_vm0, %v1479_v61, %v1241_v5 }
 0x5f5   :  { %v1253_v11 = vmul.f32 %v1252_v23, %v1230_v49  ;;  %v1250_v50 = vsel %vm1247_vm1, %v1249_v31, %v1245_v10 }
 0x5f6   :  { %v1256_v20 = vsub.f32 1.0, %v1250_v50  ;;  %v1258_v30 = vmul.f32 %v1250_v50, %v2524_v16 }
 0x5f7   :  { %v1254_v14 = vadd.f32 %v1253_v11, %v287_v29 }
 0x5f9   :  { %1480 = vtanh.f32 %v1254_v14 }
 0x5ff   :  { %v1481_v26 = vpop.eup %1480 }
 0x600   :  { %v1257_v35 = vmul.f32 %v1481_v26, %v1256_v20 }
 0x602   :  { %v1259_v36 = vadd.f32 %v1258_v30, %v1257_v35 }
 0x604   :  { %1326 = vmatmul.f32.gmra.mxu3 %v1259_v36 }
 0x687   :  { %v1327_v40 = vpop.f32.mrf.mxu3 }
 0x688   :  { %v1328_v0 = vadd.f32 %v2502_v1, %v1327_v40 }
 0x68a   :  { %1337 = vst [vmem:[%s2564_s10 + $0x38] sm:$0xff] %v1328_v0 }
 0x68b   :  { %1342 = vsyncpa [#allocation5], 1 }
 0x68c   :  { %1343 = vsyncpa [#allocation7], 1 }

</bundles_post_ra>
